<compile_context>
chip_gen: v5e
topology: v5e:2x2
jax: 0.10.0
libtpu: 0.0.40
codegen_flags: <defaults>
</compile_context>

<pallas_src>
import math

import jax
import jax.numpy as jnp
from jax import lax
from jax.experimental import pallas as pl
from jax.experimental.pallas import tpu as pltpu

# ----- module constants (fixed hyperparameters of the original file) ----------------------
HIDDEN_SIZE = 32
INPUT_SIZE = HIDDEN_SIZE          # Context_Encoder(input_size) -> split_rnn input size
H = HIDDEN_SIZE
H2 = HIDDEN_SIZE // 2             # GRU hidden per direction
HEADS = 4
ML_ATT_HIDDEN = 32
DK = ML_ATT_HIDDEN // HEADS
LN_EPS = 1e-5
NEG_INF = -100000000.0
# LAYER_NORM_USE = True and CONTEXT_ATT = True are baked into the fused kernel.


def _layer_norm(x, g, b):
    mu = jnp.mean(x, axis=-1, keepdims=True)
    var = jnp.mean(jnp.square(x - mu), axis=-1, keepdims=True)
    return (x - mu) * lax.rsqrt(var + LN_EPS) * g + b


# ==========================================================================================
# Fused kernel: bi-GRU -> LayerNorm -> MHA (+residual) -> LayerNorm
# Token rows are time-major flattened: row i <-> (t = i // B, b = i % B).
# ==========================================================================================
def _context_encoder_kernel(x_ref, len_ref, mtag_r_ref, mtag_c_ref,
                            wih_ref, bih_ref, whh_ref, bhh_ref,
                            ln1g_ref, ln1b_ref,
                            wqkv_ref, bqkv_ref, wo_ref, bo_ref,
                            ln2g_ref, ln2b_ref,
                            out_ref, hid_ref, gru_ref):
    TB = out_ref.shape[0]
    B = len_ref.shape[0]
    T = TB // B

    lens = len_ref[...]                                    # (B, 1) int32

    # ---- GRU input-to-hidden matmul, hoisted: all timesteps & both directions at once ----
    # x_ref rows carry [x_t | x_{T-1-t}] and wih is block-diagonal, so forward gate columns
    # see x_t while backward gate columns see the time-reversed token of the same row.
    # Column layout (each sub-block H2 wide): [ r_f r_b | z_f z_b | n_f n_b ].
    gx = jnp.dot(x_ref[...], wih_ref[...],
                 preferred_element_type=jnp.float32) + bih_ref[...]        # (T*B, 3*H)

    whh = whh_ref[...]                                     # (H, 3*H) block-diag per gate slab
    bhh = bhh_ref[...]                                     # (1, 3*H)

    # fwd/bwd lane selector for the fused [h_fwd | h_bwd] state, hoisted out of the loop.
    fwd_f = (lax.broadcasted_iota(jnp.int32, (B, H), 1) < H2).astype(jnp.float32)
    bwd_f = 1.0 - fwd_f

    # ---- GRU recurrence: one recurrent MXU push + one sigmoid/sigmoid/tanh over the fused
    # (B, H) state per step; fwd+bwd advanced together; no per-step concatenation.
    # Static unroll (T = 8); use lax.fori_loop(..., unroll=4) instead if T grows past ~32.
    h = jnp.zeros((B, H), jnp.float32)                     # [h_fwd | h_bwd]
    for t in range(T):
        tb = T - 1 - t
        g = gx[t * B:(t + 1) * B, :]                       # (B, 3*H): fwd gates @ t, bwd @ tb
        gh = jnp.dot(h, whh, preferred_element_type=jnp.float32) + bhh     # (B, 3*H)
        r = jax.nn.sigmoid(g[:, 0:H] + gh[:, 0:H])
        z = jax.nn.sigmoid(g[:, H:2 * H] + gh[:, H:2 * H])
        n = jnp.tanh(g[:, 2 * H:3 * H] + r * gh[:, 2 * H:3 * H])
        h_new = (1.0 - z) * n + z * h

        # per-length validity: fwd half uses time t, bwd half uses time tb
        vf = (lens > t).astype(jnp.float32)                # (B, 1)
        vb = (lens > tb).astype(jnp.float32)               # (B, 1)
        valid = fwd_f * vf + bwd_f * vb                    # (B, H) 0/1
        out_val = valid * h_new
        gru_ref[pl.ds(t * B, B), pl.ds(0, H2)] = out_val[:, 0:H2]
        gru_ref[pl.ds(tb * B, B), pl.ds(H2, H2)] = out_val[:, H2:H]
        h = h + valid * (h_new - h)                        # hold state on padded steps

    hid_ref[...] = h                                       # (B, H) = [h_fwd | h_bwd]

    # ---- split_rnn_norm -------------------------------------------------------------------
    xn = _layer_norm(gru_ref[...], ln1g_ref[...], ln1b_ref[...])           # (T*B, H)

    # ---- multi-head attention over all tokens (batch structure enforced by the mask) -----
    qkv = jnp.dot(xn, wqkv_ref[...], preferred_element_type=jnp.float32) + bqkv_ref[...]
    A = ML_ATT_HIDDEN
    q, k, v = qkv[:, 0:A], qkv[:, A:2 * A], qkv[:, 2 * A:3 * A]

    # tag: 0 for padded tokens, batch_id+1 otherwise (integer-valued f32; exact equality
    # holds for B < 2^24).  A (query, key) pair is allowed iff tags are equal and nonzero.
    tr = mtag_r_ref[...]                                   # (T*B, 1)
    tc = mtag_c_ref[...]                                   # (1, T*B)
    allowed = jnp.where((tr == tc) & (tr > 0.0), 1.0, 0.0)  # (T*B, T*B) float 0/1
    bias = (allowed - 1.0) * 1.0e8                          # 0 allowed / -1e8 masked, hoisted
    rmask = (tr > 0.0).astype(jnp.float32)                  # row mask (== "any allowed key")

    scale = 1.0 / math.sqrt(DK)
    head_outs = []
    for hd in range(HEADS):                                # static unroll; each matmul spans
        sl = slice(hd * DK, (hd + 1) * DK)                 # all tokens of all batches
        s = lax.dot_general(q[:, sl], k[:, sl], (((1,), (1,)), ((), ())),
                            preferred_element_type=jnp.float32) * scale + bias
        e = jnp.exp(s - jnp.max(s, axis=-1, keepdims=True))
        probs = e / jnp.sum(e, axis=-1, keepdims=True)     # exact softmax (torch parity)
        probs = probs * allowed                            # post-softmax re-mask (as in torch);
        head_outs.append(jnp.dot(probs, v[:, sl],          # also zeroes fully-padded rows
                                 preferred_element_type=jnp.float32))
    concat = jnp.concatenate(head_outs, axis=-1)           # (T*B, A)

    attn = jnp.dot(concat, wo_ref[...], preferred_element_type=jnp.float32) + bo_ref[...]
    attn = attn * rmask

    # ---- residual + attn_norm ---------------------------------------------------------------
    out_ref[...] = _layer_norm(xn + attn, ln2g_ref[...], ln2b_ref[...])


# ==========================================================================================
# Parameter packing (done once, outside the hot path)
# ==========================================================================================
def pack_params(p):
    """Re-pack raw (reference-layout) parameters into the fused-kernel layout.

    GRU gate columns are grouped per gate with fwd/bwd halves adjacent,
        [ r_f r_b | z_f z_b | n_f n_b ]   (each sub-block H2 wide),
    and the weight matrices are block-diagonal so that one matmul drives both directions.
    """
    D = INPUT_SIZE
    zD = jnp.zeros((D, H2), jnp.float32)
    zH2 = jnp.zeros((H2, H2), jnp.float32)

    wih = jnp.concatenate(
        [jnp.concatenate([jnp.concatenate([p["wih_f"][g], zD], axis=-1),
                          jnp.concatenate([zD, p["wih_b"][g]], axis=-1)], axis=0)
         for g in range(3)], axis=-1)                                      # (2D, 3H)
    bih = jnp.concatenate(
        [jnp.concatenate([p["bih_f"][g], p["bih_b"][g]], axis=-1) for g in range(3)],
        axis=-1)                                                           # (1, 3H)
    whh = jnp.concatenate(
        [jnp.concatenate([jnp.concatenate([p["whh_f"][g], zH2], axis=-1),
                          jnp.concatenate([zH2, p["whh_b"][g]], axis=-1)], axis=0)
         for g in range(3)], axis=-1)                                      # (H, 3H)
    bhh = jnp.concatenate(
        [jnp.concatenate([p["bhh_f"][g], p["bhh_b"][g]], axis=-1) for g in range(3)],
        axis=-1)                                                           # (1, 3H)

    wqkv = jnp.concatenate([p["wq"], p["wk"], p["wv"]], axis=-1)           # (H, 3*A)
    bqkv = jnp.concatenate([p["bq"], p["bk"], p["bv"]], axis=-1)           # (1, 3*A)
    return dict(
        wih=wih, bih=bih, whh=whh, bhh=bhh,
        ln1_g=p["ln1_g"].reshape(1, -1), ln1_b=p["ln1_b"].reshape(1, -1),
        wqkv=wqkv, bqkv=bqkv, wo=p["wo"], bo=p["bo"],
        ln2_g=p["ln2_g"].reshape(1, -1), ln2_b=p["ln2_b"].reshape(1, -1),
    )


# ==========================================================================================
# Context_Encoder.forward
# ==========================================================================================
def context_encoder_forward(splits, lengths, masks, kp):
    """splits: (B,T,D) f32; lengths: (B,) int; masks: (B,T) -> outputs (B,T,H), hidden (B,H)."""
    B, T, D = splits.shape
    TB = T * B
    # time-major flattened tokens: row i <-> (t = i // B, b = i % B);
    # each row also carries the time-reversed token for the backward GRU direction.
    x_tm = jnp.transpose(splits, (1, 0, 2))                         # (T, B, D)
    x_cat = jnp.concatenate([x_tm, x_tm[::-1]], axis=-1).reshape(TB, 2 * D)
    len2d = lengths.astype(jnp.int32).reshape(B, 1)
    m_tm = jnp.transpose(masks.astype(jnp.float32), (1, 0)).reshape(TB)
    bid = jnp.tile(jnp.arange(B, dtype=jnp.float32), T)            # batch id per token row
    mtag = (bid + 1.0) * m_tm                                       # 0 = padded, else id + 1

    out2d, hidden = pl.pallas_call(
        _context_encoder_kernel,
        out_shape=(jax.ShapeDtypeStruct((TB, H), jnp.float32),
                   jax.ShapeDtypeStruct((B, H), jnp.float32)),
        scratch_shapes=[
            pltpu.VMEM((TB, H), jnp.float32),    # bi-GRU outputs: fwd cols 0:H2, bwd H2:H
        ],
    )(x_cat, len2d, mtag.reshape(TB, 1), mtag.reshape(1, TB),
      kp["wih"], kp["bih"], kp["whh"], kp["bhh"],
      kp["ln1_g"], kp["ln1_b"],
      kp["wqkv"], kp["bqkv"], kp["wo"], kp["bo"],
      kp["ln2_g"], kp["ln2_b"])

    outputs = jnp.transpose(out2d.reshape(T, B, H), (1, 0, 2))
    return outputs, hidden


# ==========================================================================================
# Deterministic parameter init (synthetic, shapes from __init__)
# ==========================================================================================
def init_params(key):
    ks = jax.random.split(key, 16)
    w = lambda k, s: 0.1 * jax.random.normal(k, s, jnp.float32)
    p = {
        # split_rnn: bidirectional GRU, gates stored gate-major [r, z, n]
        "wih_f": w(ks[0], (3, INPUT_SIZE, H2)), "whh_f": w(ks[1], (3, H2, H2)),
        "bih_f": w(ks[2], (3, 1, H2)),          "bhh_f": w(ks[3], (3, 1, H2)),
        "wih_b": w(ks[4], (3, INPUT_SIZE, H2)), "whh_b": w(ks[5], (3, H2, H2)),
        "bih_b": w(ks[6], (3, 1, H2)),          "bhh_b": w(ks[7], (3, 1, H2)),
        # split_rnn_norm
        "ln1_g": jnp.ones((HIDDEN_SIZE,), jnp.float32),
        "ln1_b": jnp.zeros((HIDDEN_SIZE,), jnp.float32),
        # MultiHeadAttention (q/k/v/out linears)
        "wq": w(ks[8], (HIDDEN_SIZE, ML_ATT_HIDDEN)),  "bq": w(ks[9], (1, ML_ATT_HIDDEN)),
        "wk": w(ks[10], (HIDDEN_SIZE, ML_ATT_HIDDEN)), "bk": w(ks[11], (1, ML_ATT_HIDDEN)),
        "wv": w(ks[12], (HIDDEN_SIZE, ML_ATT_HIDDEN)), "bv": w(ks[13], (1, ML_ATT_HIDDEN)),
        "wo": w(ks[14], (ML_ATT_HIDDEN, HIDDEN_SIZE)), "bo": w(ks[15], (1, HIDDEN_SIZE)),
        # attn_norm
        "ln2_g": jnp.ones((HIDDEN_SIZE,), jnp.float32),
        "ln2_b": jnp.zeros((HIDDEN_SIZE,), jnp.float32),
    }
    return p


# ==========================================================================================
# Pure-JAX reference (same math) for a sanity check
# ==========================================================================================
def _ref_gru_dir(x_tm, lens, wih, whh, bih, bhh, reverse):
    T, B, _ = x_tm.shape
    valid = (jnp.arange(T)[:, None] < lens[None, :]).astype(jnp.float32)[:, :, None]

    def step(h, inp):
        x_t, v = inp
        r = jax.nn.sigmoid(x_t @ wih[0] + bih[0] + h @ whh[0] + bhh[0])
        z = jax.nn.sigmoid(x_t @ wih[1] + bih[1] + h @ whh[1] + bhh[1])
        n = jnp.tanh(x_t @ wih[2] + bih[2] + r * (h @ whh[2] + bhh[2]))
        h_new = (1.0 - z) * n + z * h
        return v * h_new + (1.0 - v) * h, v * h_new

    h0 = jnp.zeros((B, H2), jnp.float32)
    h_fin, outs = lax.scan(step, h0, (x_tm, valid), reverse=reverse)
    return jnp.transpose(outs, (1, 0, 2)), h_fin


def _ref_ln(x, g, b):
    mu = jnp.mean(x, axis=-1, keepdims=True)
    var = jnp.mean(jnp.square(x - mu), axis=-1, keepdims=True)
    return (x - mu) * lax.rsqrt(var + LN_EPS) * g + b


def reference_forward(splits, lengths, masks, p):
    B, T, _ = splits.shape
    x_tm = jnp.transpose(splits, (1, 0, 2))
    of, hf = _ref_gru_dir(x_tm, lengths, p["wih_f"], p["whh_f"], p["bih_f"], p["bhh_f"], False)
    ob, hb = _ref_gru_dir(x_tm, lengths, p["wih_b"], p["whh_b"], p["bih_b"], p["bhh_b"], True)
    outputs = jnp.concatenate([of, ob], axis=-1)
    hidden = jnp.concatenate([hf, hb], axis=-1)
    outputs = _ref_ln(outputs, p["ln1_g"], p["ln1_b"])

    am = masks[:, None, :] * masks[:, :, None]               # (B,T,T)
    q = (outputs @ p["wq"] + p["bq"]).reshape(B, T, HEADS, DK).transpose(0, 2, 1, 3)
    k = (outputs @ p["wk"] + p["bk"]).reshape(B, T, HEADS, DK).transpose(0, 2, 1, 3)
    v = (outputs @ p["wv"] + p["bv"]).reshape(B, T, HEADS, DK).transpose(0, 2, 1, 3)
    scores = jnp.einsum("bhqd,bhkd->bhqk", q, k) / math.sqrt(DK)
    mask4 = am[:, None, :, :]
    scores = jnp.where(mask4 == 0.0, NEG_INF, scores)
    probs = jax.nn.softmax(scores, axis=-1) * mask4
    attn = jnp.einsum("bhqk,bhkd->bhqd", probs, v).transpose(0, 2, 1, 3).reshape(B, T, ML_ATT_HIDDEN)
    out = attn @ p["wo"] + p["bo"]
    out = out * (jnp.sum(am, axis=-1, keepdims=True) > 0.0).astype(jnp.float32)
    res = _ref_ln(outputs + out, p["ln2_g"], p["ln2_b"])
    return res, hidden


# ==========================================================================================
if __name__ == "__main__":
    key = jax.random.PRNGKey(0)
    kparam, kx = jax.random.split(key)
    params = init_params(kparam)
    packed = pack_params(params)          # one-time re-packing into the fused-kernel layout

    B, T = 2, 8
    splits = jax.random.normal(kx, (B, T, INPUT_SIZE), jnp.float32)
    lengths = jnp.array([T, 5], jnp.int32)                       # max(lengths) == T
    masks = (jnp.arange(T)[None, :] < lengths[:, None]).astype(jnp.float32)

    outputs, hidden = context_encoder_forward(splits, lengths, masks, packed)
    outputs, hidden = jax.block_until_ready((outputs, hidden))

    ref_out, ref_hid = reference_forward(splits, lengths, masks, params)
    max_diff = max(float(jnp.max(jnp.abs(outputs - ref_out))),
                   float(jnp.max(jnp.abs(hidden - ref_hid))))
    assert max_diff < 3e-2, f"kernel/reference mismatch: {max_diff}"

    print("KERNEL_OK")
</pallas_src>

<mosaic_0001>
module attributes {stable_mosaic.version = 11 : i64} {
  func.func @_context_encoder_kernel(%arg0: memref<16x64xf32, #tpu.memory_space<vmem>>, %arg1: memref<2x1xi32, #tpu.memory_space<vmem>>, %arg2: memref<16x1xf32, #tpu.memory_space<vmem>>, %arg3: memref<1x16xf32, #tpu.memory_space<vmem>>, %arg4: memref<64x96xf32, #tpu.memory_space<vmem>>, %arg5: memref<1x96xf32, #tpu.memory_space<vmem>>, %arg6: memref<32x96xf32, #tpu.memory_space<vmem>>, %arg7: memref<1x96xf32, #tpu.memory_space<vmem>>, %arg8: memref<1x32xf32, #tpu.memory_space<vmem>>, %arg9: memref<1x32xf32, #tpu.memory_space<vmem>>, %arg10: memref<32x96xf32, #tpu.memory_space<vmem>>, %arg11: memref<1x96xf32, #tpu.memory_space<vmem>>, %arg12: memref<32x32xf32, #tpu.memory_space<vmem>>, %arg13: memref<1x32xf32, #tpu.memory_space<vmem>>, %arg14: memref<1x32xf32, #tpu.memory_space<vmem>>, %arg15: memref<1x32xf32, #tpu.memory_space<vmem>>, %arg16: memref<16x32xf32, #tpu.memory_space<vmem>>, %arg17: memref<2x32xf32, #tpu.memory_space<vmem>>, %arg18: memref<16x32xf32, #tpu.memory_space<vmem>>) attributes {dimension_semantics = [], scalar_prefetch = 0 : i64, scratch_operands = 1 : i64, tpu.core_type = #tpu.core_type<tc>} {
    %c0 = arith.constant 0 : index
    %c0_0 = arith.constant 0 : index
    %0 = vector.load %arg1[%c0, %c0_0] : memref<2x1xi32, #tpu.memory_space<vmem>>, vector<2x1xi32>
    %c0_1 = arith.constant 0 : index
    %c0_2 = arith.constant 0 : index
    %1 = vector.load %arg0[%c0_1, %c0_2] : memref<16x64xf32, #tpu.memory_space<vmem>>, vector<16x64xf32>
    %c0_3 = arith.constant 0 : index
    %c0_4 = arith.constant 0 : index
    %2 = vector.load %arg4[%c0_3, %c0_4] : memref<64x96xf32, #tpu.memory_space<vmem>>, vector<64x96xf32>
    %cst = arith.constant dense<0.000000e+00> : vector<16x96xf32>
    %3 = tpu.matmul %1, %2, %cst {dimension_numbers = #tpu.dot_dimension_numbers<[1], [0], [0], [1], [0, 0, 1, 1], [], []>} : vector<16x64xf32>, vector<64x96xf32>, vector<16x96xf32> -> vector<16x96xf32>
    %c0_5 = arith.constant 0 : index
    %c0_6 = arith.constant 0 : index
    %4 = vector.load %arg5[%c0_5, %c0_6] : memref<1x96xf32, #tpu.memory_space<vmem>>, vector<1x96xf32>
    %5 = vector.broadcast %4 : vector<1x96xf32> to vector<16x96xf32>
    %6 = arith.addf %3, %5 : vector<16x96xf32>
    %c0_7 = arith.constant 0 : index
    %c0_8 = arith.constant 0 : index
    %7 = vector.load %arg6[%c0_7, %c0_8] : memref<32x96xf32, #tpu.memory_space<vmem>>, vector<32x96xf32>
    %c0_9 = arith.constant 0 : index
    %c0_10 = arith.constant 0 : index
    %8 = vector.load %arg7[%c0_9, %c0_10] : memref<1x96xf32, #tpu.memory_space<vmem>>, vector<1x96xf32>
    %9 = tpu.iota {dimensions = array<i32: 1>} : vector<2x32xi32>
    %c16_i32 = arith.constant 16 : i32
    %10 = vector.broadcast %c16_i32 : i32 to vector<2x32xi32>
    %11 = arith.cmpi slt, %9, %10 : vector<2x32xi32>
    %12 = arith.extui %11 : vector<2x32xi1> to vector<2x32xi32>
    %13 = arith.sitofp %12 : vector<2x32xi32> to vector<2x32xf32>
    %cst_11 = arith.constant 1.000000e+00 : f32
    %14 = vector.broadcast %cst_11 : f32 to vector<2x32xf32>
    %15 = arith.subf %14, %13 : vector<2x32xf32>
    %cst_12 = arith.constant 0.000000e+00 : f32
    %16 = vector.broadcast %cst_12 : f32 to vector<2x32xf32>
    %17 = vector.extract_strided_slice %6 {offsets = [0, 0], sizes = [2, 96], strides = [1, 1]} : vector<16x96xf32> to vector<2x96xf32>
    %cst_13 = arith.constant dense<0.000000e+00> : vector<2x96xf32>
    %18 = tpu.matmul %16, %7, %cst_13 {dimension_numbers = #tpu.dot_dimension_numbers<[1], [0], [0], [1], [0, 0, 1, 1], [], []>} : vector<2x32xf32>, vector<32x96xf32>, vector<2x96xf32> -> vector<2x96xf32>
    %19 = vector.broadcast %8 : vector<1x96xf32> to vector<2x96xf32>
    %20 = arith.addf %18, %19 : vector<2x96xf32>
    %21 = vector.extract_strided_slice %17 {offsets = [0, 0], sizes = [2, 32], strides = [1, 1]} : vector<2x96xf32> to vector<2x32xf32>
    %22 = vector.extract_strided_slice %20 {offsets = [0, 0], sizes = [2, 32], strides = [1, 1]} : vector<2x96xf32> to vector<2x32xf32>
    %23 = arith.addf %21, %22 : vector<2x32xf32>
    %24 = arith.negf %23 : vector<2x32xf32>
    %25 = math.exp %24 : vector<2x32xf32>
    %cst_14 = arith.constant 1.000000e+00 : f32
    %26 = vector.broadcast %cst_14 : f32 to vector<2x32xf32>
    %27 = arith.addf %26, %25 : vector<2x32xf32>
    %28 = arith.divf %26, %27 : vector<2x32xf32>
    %29 = vector.extract_strided_slice %17 {offsets = [0, 32], sizes = [2, 32], strides = [1, 1]} : vector<2x96xf32> to vector<2x32xf32>
    %30 = vector.extract_strided_slice %20 {offsets = [0, 32], sizes = [2, 32], strides = [1, 1]} : vector<2x96xf32> to vector<2x32xf32>
    %31 = arith.addf %29, %30 : vector<2x32xf32>
    %32 = arith.negf %31 : vector<2x32xf32>
    %33 = math.exp %32 : vector<2x32xf32>
    %cst_15 = arith.constant 1.000000e+00 : f32
    %34 = vector.broadcast %cst_15 : f32 to vector<2x32xf32>
    %35 = arith.addf %34, %33 : vector<2x32xf32>
    %36 = arith.divf %34, %35 : vector<2x32xf32>
    %37 = vector.extract_strided_slice %17 {offsets = [0, 64], sizes = [2, 32], strides = [1, 1]} : vector<2x96xf32> to vector<2x32xf32>
    %38 = vector.extract_strided_slice %20 {offsets = [0, 64], sizes = [2, 32], strides = [1, 1]} : vector<2x96xf32> to vector<2x32xf32>
    %39 = arith.mulf %28, %38 : vector<2x32xf32>
    %40 = arith.addf %37, %39 : vector<2x32xf32>
    %41 = math.tanh %40 : vector<2x32xf32>
    %cst_16 = arith.constant 1.000000e+00 : f32
    %42 = vector.broadcast %cst_16 : f32 to vector<2x32xf32>
    %43 = arith.subf %42, %36 : vector<2x32xf32>
    %44 = arith.mulf %43, %41 : vector<2x32xf32>
    %45 = arith.mulf %36, %16 : vector<2x32xf32>
    %46 = arith.addf %44, %45 : vector<2x32xf32>
    %c0_i32 = arith.constant 0 : i32
    %47 = vector.broadcast %c0_i32 : i32 to vector<2x1xi32>
    %48 = arith.cmpi sgt, %0, %47 : vector<2x1xi32>
    %49 = arith.extui %48 : vector<2x1xi1> to vector<2x1xi32>
    %50 = arith.sitofp %49 : vector<2x1xi32> to vector<2x1xf32>
    %c7_i32 = arith.constant 7 : i32
    %51 = vector.broadcast %c7_i32 : i32 to vector<2x1xi32>
    %52 = arith.cmpi sgt, %0, %51 : vector<2x1xi32>
    %53 = arith.extui %52 : vector<2x1xi1> to vector<2x1xi32>
    %54 = arith.sitofp %53 : vector<2x1xi32> to vector<2x1xf32>
    %55 = vector.broadcast %50 : vector<2x1xf32> to vector<2x32xf32>
    %56 = arith.mulf %13, %55 : vector<2x32xf32>
    %57 = vector.broadcast %54 : vector<2x1xf32> to vector<2x32xf32>
    %58 = arith.mulf %15, %57 : vector<2x32xf32>
    %59 = arith.addf %56, %58 : vector<2x32xf32>
    %60 = arith.mulf %59, %46 : vector<2x32xf32>
    %61 = vector.extract_strided_slice %60 {offsets = [0, 0], sizes = [2, 16], strides = [1, 1]} : vector<2x32xf32> to vector<2x16xf32>
    %c0_17 = arith.constant 0 : index
    %c0_18 = arith.constant 0 : index
    %62 = vector.load %arg18[%c0_17, %c0_18] : memref<16x32xf32, #tpu.memory_space<vmem>>, vector<2x16xf32>
    tpu.vector_store %arg18[%c0_17, %c0_18], %61 {strides = array<i32>} : memref<16x32xf32, #tpu.memory_space<vmem>>, vector<2x16xf32>,
    %63 = vector.extract_strided_slice %60 {offsets = [0, 16], sizes = [2, 16], strides = [1, 1]} : vector<2x32xf32> to vector<2x16xf32>
    %c14 = arith.constant 14 : index
    %c16 = arith.constant 16 : index
    %64 = vector.load %arg18[%c14, %c16] : memref<16x32xf32, #tpu.memory_space<vmem>>, vector<2x16xf32>
    tpu.vector_store %arg18[%c14, %c16], %63 {strides = array<i32>} : memref<16x32xf32, #tpu.memory_space<vmem>>, vector<2x16xf32>,
    %65 = arith.subf %46, %16 : vector<2x32xf32>
    %66 = arith.mulf %59, %65 : vector<2x32xf32>
    %67 = arith.addf %16, %66 : vector<2x32xf32>
    %68 = vector.extract_strided_slice %6 {offsets = [2, 0], sizes = [2, 96], strides = [1, 1]} : vector<16x96xf32> to vector<2x96xf32>
    %cst_19 = arith.constant dense<0.000000e+00> : vector<2x96xf32>
    %69 = tpu.matmul %67, %7, %cst_19 {dimension_numbers = #tpu.dot_dimension_numbers<[1], [0], [0], [1], [0, 0, 1, 1], [], []>} : vector<2x32xf32>, vector<32x96xf32>, vector<2x96xf32> -> vector<2x96xf32>
    %70 = vector.broadcast %8 : vector<1x96xf32> to vector<2x96xf32>
    %71 = arith.addf %69, %70 : vector<2x96xf32>
    %72 = vector.extract_strided_slice %68 {offsets = [0, 0], sizes = [2, 32], strides = [1, 1]} : vector<2x96xf32> to vector<2x32xf32>
    %73 = vector.extract_strided_slice %71 {offsets = [0, 0], sizes = [2, 32], strides = [1, 1]} : vector<2x96xf32> to vector<2x32xf32>
    %74 = arith.addf %72, %73 : vector<2x32xf32>
    %75 = arith.negf %74 : vector<2x32xf32>
    %76 = math.exp %75 : vector<2x32xf32>
    %cst_20 = arith.constant 1.000000e+00 : f32
    %77 = vector.broadcast %cst_20 : f32 to vector<2x32xf32>
    %78 = arith.addf %77, %76 : vector<2x32xf32>
    %79 = arith.divf %77, %78 : vector<2x32xf32>
    %80 = vector.extract_strided_slice %68 {offsets = [0, 32], sizes = [2, 32], strides = [1, 1]} : vector<2x96xf32> to vector<2x32xf32>
    %81 = vector.extract_strided_slice %71 {offsets = [0, 32], sizes = [2, 32], strides = [1, 1]} : vector<2x96xf32> to vector<2x32xf32>
    %82 = arith.addf %80, %81 : vector<2x32xf32>
    %83 = arith.negf %82 : vector<2x32xf32>
    %84 = math.exp %83 : vector<2x32xf32>
    %cst_21 = arith.constant 1.000000e+00 : f32
    %85 = vector.broadcast %cst_21 : f32 to vector<2x32xf32>
    %86 = arith.addf %85, %84 : vector<2x32xf32>
    %87 = arith.divf %85, %86 : vector<2x32xf32>
    %88 = vector.extract_strided_slice %68 {offsets = [0, 64], sizes = [2, 32], strides = [1, 1]} : vector<2x96xf32> to vector<2x32xf32>
    %89 = vector.extract_strided_slice %71 {offsets = [0, 64], sizes = [2, 32], strides = [1, 1]} : vector<2x96xf32> to vector<2x32xf32>
    %90 = arith.mulf %79, %89 : vector<2x32xf32>
    %91 = arith.addf %88, %90 : vector<2x32xf32>
    %92 = math.tanh %91 : vector<2x32xf32>
    %cst_22 = arith.constant 1.000000e+00 : f32
    %93 = vector.broadcast %cst_22 : f32 to vector<2x32xf32>
    %94 = arith.subf %93, %87 : vector<2x32xf32>
    %95 = arith.mulf %94, %92 : vector<2x32xf32>
    %96 = arith.mulf %87, %67 : vector<2x32xf32>
    %97 = arith.addf %95, %96 : vector<2x32xf32>
    %c1_i32 = arith.constant 1 : i32
    %98 = vector.broadcast %c1_i32 : i32 to vector<2x1xi32>
    %99 = arith.cmpi sgt, %0, %98 : vector<2x1xi32>
    %100 = arith.extui %99 : vector<2x1xi1> to vector<2x1xi32>
    %101 = arith.sitofp %100 : vector<2x1xi32> to vector<2x1xf32>
    %c6_i32 = arith.constant 6 : i32
    %102 = vector.broadcast %c6_i32 : i32 to vector<2x1xi32>
    %103 = arith.cmpi sgt, %0, %102 : vector<2x1xi32>
    %104 = arith.extui %103 : vector<2x1xi1> to vector<2x1xi32>
    %105 = arith.sitofp %104 : vector<2x1xi32> to vector<2x1xf32>
    %106 = vector.broadcast %101 : vector<2x1xf32> to vector<2x32xf32>
    %107 = arith.mulf %13, %106 : vector<2x32xf32>
    %108 = vector.broadcast %105 : vector<2x1xf32> to vector<2x32xf32>
    %109 = arith.mulf %15, %108 : vector<2x32xf32>
    %110 = arith.addf %107, %109 : vector<2x32xf32>
    %111 = arith.mulf %110, %97 : vector<2x32xf32>
    %112 = vector.extract_strided_slice %111 {offsets = [0, 0], sizes = [2, 16], strides = [1, 1]} : vector<2x32xf32> to vector<2x16xf32>
    %c2 = arith.constant 2 : index
    %c0_23 = arith.constant 0 : index
    %113 = vector.load %arg18[%c2, %c0_23] : memref<16x32xf32, #tpu.memory_space<vmem>>, vector<2x16xf32>
    tpu.vector_store %arg18[%c2, %c0_23], %112 {strides = array<i32>} : memref<16x32xf32, #tpu.memory_space<vmem>>, vector<2x16xf32>,
    %114 = vector.extract_strided_slice %111 {offsets = [0, 16], sizes = [2, 16], strides = [1, 1]} : vector<2x32xf32> to vector<2x16xf32>
    %c12 = arith.constant 12 : index
    %c16_24 = arith.constant 16 : index
    %115 = vector.load %arg18[%c12, %c16_24] : memref<16x32xf32, #tpu.memory_space<vmem>>, vector<2x16xf32>
    tpu.vector_store %arg18[%c12, %c16_24], %114 {strides = array<i32>} : memref<16x32xf32, #tpu.memory_space<vmem>>, vector<2x16xf32>,
    %116 = arith.subf %97, %67 : vector<2x32xf32>
    %117 = arith.mulf %110, %116 : vector<2x32xf32>
    %118 = arith.addf %67, %117 : vector<2x32xf32>
    %119 = vector.extract_strided_slice %6 {offsets = [4, 0], sizes = [2, 96], strides = [1, 1]} : vector<16x96xf32> to vector<2x96xf32>
    %cst_25 = arith.constant dense<0.000000e+00> : vector<2x96xf32>
    %120 = tpu.matmul %118, %7, %cst_25 {dimension_numbers = #tpu.dot_dimension_numbers<[1], [0], [0], [1], [0, 0, 1, 1], [], []>} : vector<2x32xf32>, vector<32x96xf32>, vector<2x96xf32> -> vector<2x96xf32>
    %121 = vector.broadcast %8 : vector<1x96xf32> to vector<2x96xf32>
    %122 = arith.addf %120, %121 : vector<2x96xf32>
    %123 = vector.extract_strided_slice %119 {offsets = [0, 0], sizes = [2, 32], strides = [1, 1]} : vector<2x96xf32> to vector<2x32xf32>
    %124 = vector.extract_strided_slice %122 {offsets = [0, 0], sizes = [2, 32], strides = [1, 1]} : vector<2x96xf32> to vector<2x32xf32>
    %125 = arith.addf %123, %124 : vector<2x32xf32>
    %126 = arith.negf %125 : vector<2x32xf32>
    %127 = math.exp %126 : vector<2x32xf32>
    %cst_26 = arith.constant 1.000000e+00 : f32
    %128 = vector.broadcast %cst_26 : f32 to vector<2x32xf32>
    %129 = arith.addf %128, %127 : vector<2x32xf32>
    %130 = arith.divf %128, %129 : vector<2x32xf32>
    %131 = vector.extract_strided_slice %119 {offsets = [0, 32], sizes = [2, 32], strides = [1, 1]} : vector<2x96xf32> to vector<2x32xf32>
    %132 = vector.extract_strided_slice %122 {offsets = [0, 32], sizes = [2, 32], strides = [1, 1]} : vector<2x96xf32> to vector<2x32xf32>
    %133 = arith.addf %131, %132 : vector<2x32xf32>
    %134 = arith.negf %133 : vector<2x32xf32>
    %135 = math.exp %134 : vector<2x32xf32>
    %cst_27 = arith.constant 1.000000e+00 : f32
    %136 = vector.broadcast %cst_27 : f32 to vector<2x32xf32>
    %137 = arith.addf %136, %135 : vector<2x32xf32>
    %138 = arith.divf %136, %137 : vector<2x32xf32>
    %139 = vector.extract_strided_slice %119 {offsets = [0, 64], sizes = [2, 32], strides = [1, 1]} : vector<2x96xf32> to vector<2x32xf32>
    %140 = vector.extract_strided_slice %122 {offsets = [0, 64], sizes = [2, 32], strides = [1, 1]} : vector<2x96xf32> to vector<2x32xf32>
    %141 = arith.mulf %130, %140 : vector<2x32xf32>
    %142 = arith.addf %139, %141 : vector<2x32xf32>
    %143 = math.tanh %142 : vector<2x32xf32>
    %cst_28 = arith.constant 1.000000e+00 : f32
    %144 = vector.broadcast %cst_28 : f32 to vector<2x32xf32>
    %145 = arith.subf %144, %138 : vector<2x32xf32>
    %146 = arith.mulf %145, %143 : vector<2x32xf32>
    %147 = arith.mulf %138, %118 : vector<2x32xf32>
    %148 = arith.addf %146, %147 : vector<2x32xf32>
    %c2_i32 = arith.constant 2 : i32
    %149 = vector.broadcast %c2_i32 : i32 to vector<2x1xi32>
    %150 = arith.cmpi sgt, %0, %149 : vector<2x1xi32>
    %151 = arith.extui %150 : vector<2x1xi1> to vector<2x1xi32>
    %152 = arith.sitofp %151 : vector<2x1xi32> to vector<2x1xf32>
    %c5_i32 = arith.constant 5 : i32
    %153 = vector.broadcast %c5_i32 : i32 to vector<2x1xi32>
    %154 = arith.cmpi sgt, %0, %153 : vector<2x1xi32>
    %155 = arith.extui %154 : vector<2x1xi1> to vector<2x1xi32>
    %156 = arith.sitofp %155 : vector<2x1xi32> to vector<2x1xf32>
    %157 = vector.broadcast %152 : vector<2x1xf32> to vector<2x32xf32>
    %158 = arith.mulf %13, %157 : vector<2x32xf32>
    %159 = vector.broadcast %156 : vector<2x1xf32> to vector<2x32xf32>
    %160 = arith.mulf %15, %159 : vector<2x32xf32>
    %161 = arith.addf %158, %160 : vector<2x32xf32>
    %162 = arith.mulf %161, %148 : vector<2x32xf32>
    %163 = vector.extract_strided_slice %162 {offsets = [0, 0], sizes = [2, 16], strides = [1, 1]} : vector<2x32xf32> to vector<2x16xf32>
    %c4 = arith.constant 4 : index
    %c0_29 = arith.constant 0 : index
    %164 = vector.load %arg18[%c4, %c0_29] : memref<16x32xf32, #tpu.memory_space<vmem>>, vector<2x16xf32>
    tpu.vector_store %arg18[%c4, %c0_29], %163 {strides = array<i32>} : memref<16x32xf32, #tpu.memory_space<vmem>>, vector<2x16xf32>,
    %165 = vector.extract_strided_slice %162 {offsets = [0, 16], sizes = [2, 16], strides = [1, 1]} : vector<2x32xf32> to vector<2x16xf32>
    %c10 = arith.constant 10 : index
    %c16_30 = arith.constant 16 : index
    %166 = vector.load %arg18[%c10, %c16_30] : memref<16x32xf32, #tpu.memory_space<vmem>>, vector<2x16xf32>
    tpu.vector_store %arg18[%c10, %c16_30], %165 {strides = array<i32>} : memref<16x32xf32, #tpu.memory_space<vmem>>, vector<2x16xf32>,
    %167 = arith.subf %148, %118 : vector<2x32xf32>
    %168 = arith.mulf %161, %167 : vector<2x32xf32>
    %169 = arith.addf %118, %168 : vector<2x32xf32>
    %170 = vector.extract_strided_slice %6 {offsets = [6, 0], sizes = [2, 96], strides = [1, 1]} : vector<16x96xf32> to vector<2x96xf32>
    %cst_31 = arith.constant dense<0.000000e+00> : vector<2x96xf32>
    %171 = tpu.matmul %169, %7, %cst_31 {dimension_numbers = #tpu.dot_dimension_numbers<[1], [0], [0], [1], [0, 0, 1, 1], [], []>} : vector<2x32xf32>, vector<32x96xf32>, vector<2x96xf32> -> vector<2x96xf32>
    %172 = vector.broadcast %8 : vector<1x96xf32> to vector<2x96xf32>
    %173 = arith.addf %171, %172 : vector<2x96xf32>
    %174 = vector.extract_strided_slice %170 {offsets = [0, 0], sizes = [2, 32], strides = [1, 1]} : vector<2x96xf32> to vector<2x32xf32>
    %175 = vector.extract_strided_slice %173 {offsets = [0, 0], sizes = [2, 32], strides = [1, 1]} : vector<2x96xf32> to vector<2x32xf32>
    %176 = arith.addf %174, %175 : vector<2x32xf32>
    %177 = arith.negf %176 : vector<2x32xf32>
    %178 = math.exp %177 : vector<2x32xf32>
    %cst_32 = arith.constant 1.000000e+00 : f32
    %179 = vector.broadcast %cst_32 : f32 to vector<2x32xf32>
    %180 = arith.addf %179, %178 : vector<2x32xf32>
    %181 = arith.divf %179, %180 : vector<2x32xf32>
    %182 = vector.extract_strided_slice %170 {offsets = [0, 32], sizes = [2, 32], strides = [1, 1]} : vector<2x96xf32> to vector<2x32xf32>
    %183 = vector.extract_strided_slice %173 {offsets = [0, 32], sizes = [2, 32], strides = [1, 1]} : vector<2x96xf32> to vector<2x32xf32>
    %184 = arith.addf %182, %183 : vector<2x32xf32>
    %185 = arith.negf %184 : vector<2x32xf32>
    %186 = math.exp %185 : vector<2x32xf32>
    %cst_33 = arith.constant 1.000000e+00 : f32
    %187 = vector.broadcast %cst_33 : f32 to vector<2x32xf32>
    %188 = arith.addf %187, %186 : vector<2x32xf32>
    %189 = arith.divf %187, %188 : vector<2x32xf32>
    %190 = vector.extract_strided_slice %170 {offsets = [0, 64], sizes = [2, 32], strides = [1, 1]} : vector<2x96xf32> to vector<2x32xf32>
    %191 = vector.extract_strided_slice %173 {offsets = [0, 64], sizes = [2, 32], strides = [1, 1]} : vector<2x96xf32> to vector<2x32xf32>
    %192 = arith.mulf %181, %191 : vector<2x32xf32>
    %193 = arith.addf %190, %192 : vector<2x32xf32>
    %194 = math.tanh %193 : vector<2x32xf32>
    %cst_34 = arith.constant 1.000000e+00 : f32
    %195 = vector.broadcast %cst_34 : f32 to vector<2x32xf32>
    %196 = arith.subf %195, %189 : vector<2x32xf32>
    %197 = arith.mulf %196, %194 : vector<2x32xf32>
    %198 = arith.mulf %189, %169 : vector<2x32xf32>
    %199 = arith.addf %197, %198 : vector<2x32xf32>
    %c3_i32 = arith.constant 3 : i32
    %200 = vector.broadcast %c3_i32 : i32 to vector<2x1xi32>
    %201 = arith.cmpi sgt, %0, %200 : vector<2x1xi32>
    %202 = arith.extui %201 : vector<2x1xi1> to vector<2x1xi32>
    %203 = arith.sitofp %202 : vector<2x1xi32> to vector<2x1xf32>
    %c4_i32 = arith.constant 4 : i32
    %204 = vector.broadcast %c4_i32 : i32 to vector<2x1xi32>
    %205 = arith.cmpi sgt, %0, %204 : vector<2x1xi32>
    %206 = arith.extui %205 : vector<2x1xi1> to vector<2x1xi32>
    %207 = arith.sitofp %206 : vector<2x1xi32> to vector<2x1xf32>
    %208 = vector.broadcast %203 : vector<2x1xf32> to vector<2x32xf32>
    %209 = arith.mulf %13, %208 : vector<2x32xf32>
    %210 = vector.broadcast %207 : vector<2x1xf32> to vector<2x32xf32>
    %211 = arith.mulf %15, %210 : vector<2x32xf32>
    %212 = arith.addf %209, %211 : vector<2x32xf32>
    %213 = arith.mulf %212, %199 : vector<2x32xf32>
    %214 = vector.extract_strided_slice %213 {offsets = [0, 0], sizes = [2, 16], strides = [1, 1]} : vector<2x32xf32> to vector<2x16xf32>
    %c6 = arith.constant 6 : index
    %c0_35 = arith.constant 0 : index
    %215 = vector.load %arg18[%c6, %c0_35] : memref<16x32xf32, #tpu.memory_space<vmem>>, vector<2x16xf32>
    tpu.vector_store %arg18[%c6, %c0_35], %214 {strides = array<i32>} : memref<16x32xf32, #tpu.memory_space<vmem>>, vector<2x16xf32>,
    %216 = vector.extract_strided_slice %213 {offsets = [0, 16], sizes = [2, 16], strides = [1, 1]} : vector<2x32xf32> to vector<2x16xf32>
    %c8 = arith.constant 8 : index
    %c16_36 = arith.constant 16 : index
    %217 = vector.load %arg18[%c8, %c16_36] : memref<16x32xf32, #tpu.memory_space<vmem>>, vector<2x16xf32>
    tpu.vector_store %arg18[%c8, %c16_36], %216 {strides = array<i32>} : memref<16x32xf32, #tpu.memory_space<vmem>>, vector<2x16xf32>,
    %218 = arith.subf %199, %169 : vector<2x32xf32>
    %219 = arith.mulf %212, %218 : vector<2x32xf32>
    %220 = arith.addf %169, %219 : vector<2x32xf32>
    %221 = vector.extract_strided_slice %6 {offsets = [8, 0], sizes = [2, 96], strides = [1, 1]} : vector<16x96xf32> to vector<2x96xf32>
    %cst_37 = arith.constant dense<0.000000e+00> : vector<2x96xf32>
    %222 = tpu.matmul %220, %7, %cst_37 {dimension_numbers = #tpu.dot_dimension_numbers<[1], [0], [0], [1], [0, 0, 1, 1], [], []>} : vector<2x32xf32>, vector<32x96xf32>, vector<2x96xf32> -> vector<2x96xf32>
    %223 = vector.broadcast %8 : vector<1x96xf32> to vector<2x96xf32>
    %224 = arith.addf %222, %223 : vector<2x96xf32>
    %225 = vector.extract_strided_slice %221 {offsets = [0, 0], sizes = [2, 32], strides = [1, 1]} : vector<2x96xf32> to vector<2x32xf32>
    %226 = vector.extract_strided_slice %224 {offsets = [0, 0], sizes = [2, 32], strides = [1, 1]} : vector<2x96xf32> to vector<2x32xf32>
    %227 = arith.addf %225, %226 : vector<2x32xf32>
    %228 = arith.negf %227 : vector<2x32xf32>
    %229 = math.exp %228 : vector<2x32xf32>
    %cst_38 = arith.constant 1.000000e+00 : f32
    %230 = vector.broadcast %cst_38 : f32 to vector<2x32xf32>
    %231 = arith.addf %230, %229 : vector<2x32xf32>
    %232 = arith.divf %230, %231 : vector<2x32xf32>
    %233 = vector.extract_strided_slice %221 {offsets = [0, 32], sizes = [2, 32], strides = [1, 1]} : vector<2x96xf32> to vector<2x32xf32>
    %234 = vector.extract_strided_slice %224 {offsets = [0, 32], sizes = [2, 32], strides = [1, 1]} : vector<2x96xf32> to vector<2x32xf32>
    %235 = arith.addf %233, %234 : vector<2x32xf32>
    %236 = arith.negf %235 : vector<2x32xf32>
    %237 = math.exp %236 : vector<2x32xf32>
    %cst_39 = arith.constant 1.000000e+00 : f32
    %238 = vector.broadcast %cst_39 : f32 to vector<2x32xf32>
    %239 = arith.addf %238, %237 : vector<2x32xf32>
    %240 = arith.divf %238, %239 : vector<2x32xf32>
    %241 = vector.extract_strided_slice %221 {offsets = [0, 64], sizes = [2, 32], strides = [1, 1]} : vector<2x96xf32> to vector<2x32xf32>
    %242 = vector.extract_strided_slice %224 {offsets = [0, 64], sizes = [2, 32], strides = [1, 1]} : vector<2x96xf32> to vector<2x32xf32>
    %243 = arith.mulf %232, %242 : vector<2x32xf32>
    %244 = arith.addf %241, %243 : vector<2x32xf32>
    %245 = math.tanh %244 : vector<2x32xf32>
    %cst_40 = arith.constant 1.000000e+00 : f32
    %246 = vector.broadcast %cst_40 : f32 to vector<2x32xf32>
    %247 = arith.subf %246, %240 : vector<2x32xf32>
    %248 = arith.mulf %247, %245 : vector<2x32xf32>
    %249 = arith.mulf %240, %220 : vector<2x32xf32>
    %250 = arith.addf %248, %249 : vector<2x32xf32>
    %c4_i32_41 = arith.constant 4 : i32
    %251 = vector.broadcast %c4_i32_41 : i32 to vector<2x1xi32>
    %252 = arith.cmpi sgt, %0, %251 : vector<2x1xi32>
    %253 = arith.extui %252 : vector<2x1xi1> to vector<2x1xi32>
    %254 = arith.sitofp %253 : vector<2x1xi32> to vector<2x1xf32>
    %c3_i32_42 = arith.constant 3 : i32
    %255 = vector.broadcast %c3_i32_42 : i32 to vector<2x1xi32>
    %256 = arith.cmpi sgt, %0, %255 : vector<2x1xi32>
    %257 = arith.extui %256 : vector<2x1xi1> to vector<2x1xi32>
    %258 = arith.sitofp %257 : vector<2x1xi32> to vector<2x1xf32>
    %259 = vector.broadcast %254 : vector<2x1xf32> to vector<2x32xf32>
    %260 = arith.mulf %13, %259 : vector<2x32xf32>
    %261 = vector.broadcast %258 : vector<2x1xf32> to vector<2x32xf32>
    %262 = arith.mulf %15, %261 : vector<2x32xf32>
    %263 = arith.addf %260, %262 : vector<2x32xf32>
    %264 = arith.mulf %263, %250 : vector<2x32xf32>
    %265 = vector.extract_strided_slice %264 {offsets = [0, 0], sizes = [2, 16], strides = [1, 1]} : vector<2x32xf32> to vector<2x16xf32>
    %c8_43 = arith.constant 8 : index
    %c0_44 = arith.constant 0 : index
    %266 = vector.load %arg18[%c8_43, %c0_44] : memref<16x32xf32, #tpu.memory_space<vmem>>, vector<2x16xf32>
    tpu.vector_store %arg18[%c8_43, %c0_44], %265 {strides = array<i32>} : memref<16x32xf32, #tpu.memory_space<vmem>>, vector<2x16xf32>,
    %267 = vector.extract_strided_slice %264 {offsets = [0, 16], sizes = [2, 16], strides = [1, 1]} : vector<2x32xf32> to vector<2x16xf32>
    %c6_45 = arith.constant 6 : index
    %c16_46 = arith.constant 16 : index
    %268 = vector.load %arg18[%c6_45, %c16_46] : memref<16x32xf32, #tpu.memory_space<vmem>>, vector<2x16xf32>
    tpu.vector_store %arg18[%c6_45, %c16_46], %267 {strides = array<i32>} : memref<16x32xf32, #tpu.memory_space<vmem>>, vector<2x16xf32>,
    %269 = arith.subf %250, %220 : vector<2x32xf32>
    %270 = arith.mulf %263, %269 : vector<2x32xf32>
    %271 = arith.addf %220, %270 : vector<2x32xf32>
    %272 = vector.extract_strided_slice %6 {offsets = [10, 0], sizes = [2, 96], strides = [1, 1]} : vector<16x96xf32> to vector<2x96xf32>
    %cst_47 = arith.constant dense<0.000000e+00> : vector<2x96xf32>
    %273 = tpu.matmul %271, %7, %cst_47 {dimension_numbers = #tpu.dot_dimension_numbers<[1], [0], [0], [1], [0, 0, 1, 1], [], []>} : vector<2x32xf32>, vector<32x96xf32>, vector<2x96xf32> -> vector<2x96xf32>
    %274 = vector.broadcast %8 : vector<1x96xf32> to vector<2x96xf32>
    %275 = arith.addf %273, %274 : vector<2x96xf32>
    %276 = vector.extract_strided_slice %272 {offsets = [0, 0], sizes = [2, 32], strides = [1, 1]} : vector<2x96xf32> to vector<2x32xf32>
    %277 = vector.extract_strided_slice %275 {offsets = [0, 0], sizes = [2, 32], strides = [1, 1]} : vector<2x96xf32> to vector<2x32xf32>
    %278 = arith.addf %276, %277 : vector<2x32xf32>
    %279 = arith.negf %278 : vector<2x32xf32>
    %280 = math.exp %279 : vector<2x32xf32>
    %cst_48 = arith.constant 1.000000e+00 : f32
    %281 = vector.broadcast %cst_48 : f32 to vector<2x32xf32>
    %282 = arith.addf %281, %280 : vector<2x32xf32>
    %283 = arith.divf %281, %282 : vector<2x32xf32>
    %284 = vector.extract_strided_slice %272 {offsets = [0, 32], sizes = [2, 32], strides = [1, 1]} : vector<2x96xf32> to vector<2x32xf32>
    %285 = vector.extract_strided_slice %275 {offsets = [0, 32], sizes = [2, 32], strides = [1, 1]} : vector<2x96xf32> to vector<2x32xf32>
    %286 = arith.addf %284, %285 : vector<2x32xf32>
    %287 = arith.negf %286 : vector<2x32xf32>
    %288 = math.exp %287 : vector<2x32xf32>
    %cst_49 = arith.constant 1.000000e+00 : f32
    %289 = vector.broadcast %cst_49 : f32 to vector<2x32xf32>
    %290 = arith.addf %289, %288 : vector<2x32xf32>
    %291 = arith.divf %289, %290 : vector<2x32xf32>
    %292 = vector.extract_strided_slice %272 {offsets = [0, 64], sizes = [2, 32], strides = [1, 1]} : vector<2x96xf32> to vector<2x32xf32>
    %293 = vector.extract_strided_slice %275 {offsets = [0, 64], sizes = [2, 32], strides = [1, 1]} : vector<2x96xf32> to vector<2x32xf32>
    %294 = arith.mulf %283, %293 : vector<2x32xf32>
    %295 = arith.addf %292, %294 : vector<2x32xf32>
    %296 = math.tanh %295 : vector<2x32xf32>
    %cst_50 = arith.constant 1.000000e+00 : f32
    %297 = vector.broadcast %cst_50 : f32 to vector<2x32xf32>
    %298 = arith.subf %297, %291 : vector<2x32xf32>
    %299 = arith.mulf %298, %296 : vector<2x32xf32>
    %300 = arith.mulf %291, %271 : vector<2x32xf32>
    %301 = arith.addf %299, %300 : vector<2x32xf32>
    %c5_i32_51 = arith.constant 5 : i32
    %302 = vector.broadcast %c5_i32_51 : i32 to vector<2x1xi32>
    %303 = arith.cmpi sgt, %0, %302 : vector<2x1xi32>
    %304 = arith.extui %303 : vector<2x1xi1> to vector<2x1xi32>
    %305 = arith.sitofp %304 : vector<2x1xi32> to vector<2x1xf32>
    %c2_i32_52 = arith.constant 2 : i32
    %306 = vector.broadcast %c2_i32_52 : i32 to vector<2x1xi32>
    %307 = arith.cmpi sgt, %0, %306 : vector<2x1xi32>
    %308 = arith.extui %307 : vector<2x1xi1> to vector<2x1xi32>
    %309 = arith.sitofp %308 : vector<2x1xi32> to vector<2x1xf32>
    %310 = vector.broadcast %305 : vector<2x1xf32> to vector<2x32xf32>
    %311 = arith.mulf %13, %310 : vector<2x32xf32>
    %312 = vector.broadcast %309 : vector<2x1xf32> to vector<2x32xf32>
    %313 = arith.mulf %15, %312 : vector<2x32xf32>
    %314 = arith.addf %311, %313 : vector<2x32xf32>
    %315 = arith.mulf %314, %301 : vector<2x32xf32>
    %316 = vector.extract_strided_slice %315 {offsets = [0, 0], sizes = [2, 16], strides = [1, 1]} : vector<2x32xf32> to vector<2x16xf32>
    %c10_53 = arith.constant 10 : index
    %c0_54 = arith.constant 0 : index
    %317 = vector.load %arg18[%c10_53, %c0_54] : memref<16x32xf32, #tpu.memory_space<vmem>>, vector<2x16xf32>
    tpu.vector_store %arg18[%c10_53, %c0_54], %316 {strides = array<i32>} : memref<16x32xf32, #tpu.memory_space<vmem>>, vector<2x16xf32>,
    %318 = vector.extract_strided_slice %315 {offsets = [0, 16], sizes = [2, 16], strides = [1, 1]} : vector<2x32xf32> to vector<2x16xf32>
    %c4_55 = arith.constant 4 : index
    %c16_56 = arith.constant 16 : index
    %319 = vector.load %arg18[%c4_55, %c16_56] : memref<16x32xf32, #tpu.memory_space<vmem>>, vector<2x16xf32>
    tpu.vector_store %arg18[%c4_55, %c16_56], %318 {strides = array<i32>} : memref<16x32xf32, #tpu.memory_space<vmem>>, vector<2x16xf32>,
    %320 = arith.subf %301, %271 : vector<2x32xf32>
    %321 = arith.mulf %314, %320 : vector<2x32xf32>
    %322 = arith.addf %271, %321 : vector<2x32xf32>
    %323 = vector.extract_strided_slice %6 {offsets = [12, 0], sizes = [2, 96], strides = [1, 1]} : vector<16x96xf32> to vector<2x96xf32>
    %cst_57 = arith.constant dense<0.000000e+00> : vector<2x96xf32>
    %324 = tpu.matmul %322, %7, %cst_57 {dimension_numbers = #tpu.dot_dimension_numbers<[1], [0], [0], [1], [0, 0, 1, 1], [], []>} : vector<2x32xf32>, vector<32x96xf32>, vector<2x96xf32> -> vector<2x96xf32>
    %325 = vector.broadcast %8 : vector<1x96xf32> to vector<2x96xf32>
    %326 = arith.addf %324, %325 : vector<2x96xf32>
    %327 = vector.extract_strided_slice %323 {offsets = [0, 0], sizes = [2, 32], strides = [1, 1]} : vector<2x96xf32> to vector<2x32xf32>
    %328 = vector.extract_strided_slice %326 {offsets = [0, 0], sizes = [2, 32], strides = [1, 1]} : vector<2x96xf32> to vector<2x32xf32>
    %329 = arith.addf %327, %328 : vector<2x32xf32>
    %330 = arith.negf %329 : vector<2x32xf32>
    %331 = math.exp %330 : vector<2x32xf32>
    %cst_58 = arith.constant 1.000000e+00 : f32
    %332 = vector.broadcast %cst_58 : f32 to vector<2x32xf32>
    %333 = arith.addf %332, %331 : vector<2x32xf32>
    %334 = arith.divf %332, %333 : vector<2x32xf32>
    %335 = vector.extract_strided_slice %323 {offsets = [0, 32], sizes = [2, 32], strides = [1, 1]} : vector<2x96xf32> to vector<2x32xf32>
    %336 = vector.extract_strided_slice %326 {offsets = [0, 32], sizes = [2, 32], strides = [1, 1]} : vector<2x96xf32> to vector<2x32xf32>
    %337 = arith.addf %335, %336 : vector<2x32xf32>
    %338 = arith.negf %337 : vector<2x32xf32>
    %339 = math.exp %338 : vector<2x32xf32>
    %cst_59 = arith.constant 1.000000e+00 : f32
    %340 = vector.broadcast %cst_59 : f32 to vector<2x32xf32>
    %341 = arith.addf %340, %339 : vector<2x32xf32>
    %342 = arith.divf %340, %341 : vector<2x32xf32>
    %343 = vector.extract_strided_slice %323 {offsets = [0, 64], sizes = [2, 32], strides = [1, 1]} : vector<2x96xf32> to vector<2x32xf32>
    %344 = vector.extract_strided_slice %326 {offsets = [0, 64], sizes = [2, 32], strides = [1, 1]} : vector<2x96xf32> to vector<2x32xf32>
    %345 = arith.mulf %334, %344 : vector<2x32xf32>
    %346 = arith.addf %343, %345 : vector<2x32xf32>
    %347 = math.tanh %346 : vector<2x32xf32>
    %cst_60 = arith.constant 1.000000e+00 : f32
    %348 = vector.broadcast %cst_60 : f32 to vector<2x32xf32>
    %349 = arith.subf %348, %342 : vector<2x32xf32>
    %350 = arith.mulf %349, %347 : vector<2x32xf32>
    %351 = arith.mulf %342, %322 : vector<2x32xf32>
    %352 = arith.addf %350, %351 : vector<2x32xf32>
    %c6_i32_61 = arith.constant 6 : i32
    %353 = vector.broadcast %c6_i32_61 : i32 to vector<2x1xi32>
    %354 = arith.cmpi sgt, %0, %353 : vector<2x1xi32>
    %355 = arith.extui %354 : vector<2x1xi1> to vector<2x1xi32>
    %356 = arith.sitofp %355 : vector<2x1xi32> to vector<2x1xf32>
    %c1_i32_62 = arith.constant 1 : i32
    %357 = vector.broadcast %c1_i32_62 : i32 to vector<2x1xi32>
    %358 = arith.cmpi sgt, %0, %357 : vector<2x1xi32>
    %359 = arith.extui %358 : vector<2x1xi1> to vector<2x1xi32>
    %360 = arith.sitofp %359 : vector<2x1xi32> to vector<2x1xf32>
    %361 = vector.broadcast %356 : vector<2x1xf32> to vector<2x32xf32>
    %362 = arith.mulf %13, %361 : vector<2x32xf32>
    %363 = vector.broadcast %360 : vector<2x1xf32> to vector<2x32xf32>
    %364 = arith.mulf %15, %363 : vector<2x32xf32>
    %365 = arith.addf %362, %364 : vector<2x32xf32>
    %366 = arith.mulf %365, %352 : vector<2x32xf32>
    %367 = vector.extract_strided_slice %366 {offsets = [0, 0], sizes = [2, 16], strides = [1, 1]} : vector<2x32xf32> to vector<2x16xf32>
    %c12_63 = arith.constant 12 : index
    %c0_64 = arith.constant 0 : index
    %368 = vector.load %arg18[%c12_63, %c0_64] : memref<16x32xf32, #tpu.memory_space<vmem>>, vector<2x16xf32>
    tpu.vector_store %arg18[%c12_63, %c0_64], %367 {strides = array<i32>} : memref<16x32xf32, #tpu.memory_space<vmem>>, vector<2x16xf32>,
    %369 = vector.extract_strided_slice %366 {offsets = [0, 16], sizes = [2, 16], strides = [1, 1]} : vector<2x32xf32> to vector<2x16xf32>
    %c2_65 = arith.constant 2 : index
    %c16_66 = arith.constant 16 : index
    %370 = vector.load %arg18[%c2_65, %c16_66] : memref<16x32xf32, #tpu.memory_space<vmem>>, vector<2x16xf32>
    tpu.vector_store %arg18[%c2_65, %c16_66], %369 {strides = array<i32>} : memref<16x32xf32, #tpu.memory_space<vmem>>, vector<2x16xf32>,
    %371 = arith.subf %352, %322 : vector<2x32xf32>
    %372 = arith.mulf %365, %371 : vector<2x32xf32>
    %373 = arith.addf %322, %372 : vector<2x32xf32>
    %374 = vector.extract_strided_slice %6 {offsets = [14, 0], sizes = [2, 96], strides = [1, 1]} : vector<16x96xf32> to vector<2x96xf32>
    %cst_67 = arith.constant dense<0.000000e+00> : vector<2x96xf32>
    %375 = tpu.matmul %373, %7, %cst_67 {dimension_numbers = #tpu.dot_dimension_numbers<[1], [0], [0], [1], [0, 0, 1, 1], [], []>} : vector<2x32xf32>, vector<32x96xf32>, vector<2x96xf32> -> vector<2x96xf32>
    %376 = vector.broadcast %8 : vector<1x96xf32> to vector<2x96xf32>
    %377 = arith.addf %375, %376 : vector<2x96xf32>
    %378 = vector.extract_strided_slice %374 {offsets = [0, 0], sizes = [2, 32], strides = [1, 1]} : vector<2x96xf32> to vector<2x32xf32>
    %379 = vector.extract_strided_slice %377 {offsets = [0, 0], sizes = [2, 32], strides = [1, 1]} : vector<2x96xf32> to vector<2x32xf32>
    %380 = arith.addf %378, %379 : vector<2x32xf32>
    %381 = arith.negf %380 : vector<2x32xf32>
    %382 = math.exp %381 : vector<2x32xf32>
    %cst_68 = arith.constant 1.000000e+00 : f32
    %383 = vector.broadcast %cst_68 : f32 to vector<2x32xf32>
    %384 = arith.addf %383, %382 : vector<2x32xf32>
    %385 = arith.divf %383, %384 : vector<2x32xf32>
    %386 = vector.extract_strided_slice %374 {offsets = [0, 32], sizes = [2, 32], strides = [1, 1]} : vector<2x96xf32> to vector<2x32xf32>
    %387 = vector.extract_strided_slice %377 {offsets = [0, 32], sizes = [2, 32], strides = [1, 1]} : vector<2x96xf32> to vector<2x32xf32>
    %388 = arith.addf %386, %387 : vector<2x32xf32>
    %389 = arith.negf %388 : vector<2x32xf32>
    %390 = math.exp %389 : vector<2x32xf32>
    %cst_69 = arith.constant 1.000000e+00 : f32
    %391 = vector.broadcast %cst_69 : f32 to vector<2x32xf32>
    %392 = arith.addf %391, %390 : vector<2x32xf32>
    %393 = arith.divf %391, %392 : vector<2x32xf32>
    %394 = vector.extract_strided_slice %374 {offsets = [0, 64], sizes = [2, 32], strides = [1, 1]} : vector<2x96xf32> to vector<2x32xf32>
    %395 = vector.extract_strided_slice %377 {offsets = [0, 64], sizes = [2, 32], strides = [1, 1]} : vector<2x96xf32> to vector<2x32xf32>
    %396 = arith.mulf %385, %395 : vector<2x32xf32>
    %397 = arith.addf %394, %396 : vector<2x32xf32>
    %398 = math.tanh %397 : vector<2x32xf32>
    %cst_70 = arith.constant 1.000000e+00 : f32
    %399 = vector.broadcast %cst_70 : f32 to vector<2x32xf32>
    %400 = arith.subf %399, %393 : vector<2x32xf32>
    %401 = arith.mulf %400, %398 : vector<2x32xf32>
    %402 = arith.mulf %393, %373 : vector<2x32xf32>
    %403 = arith.addf %401, %402 : vector<2x32xf32>
    %c7_i32_71 = arith.constant 7 : i32
    %404 = vector.broadcast %c7_i32_71 : i32 to vector<2x1xi32>
    %405 = arith.cmpi sgt, %0, %404 : vector<2x1xi32>
    %406 = arith.extui %405 : vector<2x1xi1> to vector<2x1xi32>
    %407 = arith.sitofp %406 : vector<2x1xi32> to vector<2x1xf32>
    %c0_i32_72 = arith.constant 0 : i32
    %408 = vector.broadcast %c0_i32_72 : i32 to vector<2x1xi32>
    %409 = arith.cmpi sgt, %0, %408 : vector<2x1xi32>
    %410 = arith.extui %409 : vector<2x1xi1> to vector<2x1xi32>
    %411 = arith.sitofp %410 : vector<2x1xi32> to vector<2x1xf32>
    %412 = vector.broadcast %407 : vector<2x1xf32> to vector<2x32xf32>
    %413 = arith.mulf %13, %412 : vector<2x32xf32>
    %414 = vector.broadcast %411 : vector<2x1xf32> to vector<2x32xf32>
    %415 = arith.mulf %15, %414 : vector<2x32xf32>
    %416 = arith.addf %413, %415 : vector<2x32xf32>
    %417 = arith.mulf %416, %403 : vector<2x32xf32>
    %418 = vector.extract_strided_slice %417 {offsets = [0, 0], sizes = [2, 16], strides = [1, 1]} : vector<2x32xf32> to vector<2x16xf32>
    %c14_73 = arith.constant 14 : index
    %c0_74 = arith.constant 0 : index
    %419 = vector.load %arg18[%c14_73, %c0_74] : memref<16x32xf32, #tpu.memory_space<vmem>>, vector<2x16xf32>
    tpu.vector_store %arg18[%c14_73, %c0_74], %418 {strides = array<i32>} : memref<16x32xf32, #tpu.memory_space<vmem>>, vector<2x16xf32>,
    %420 = vector.extract_strided_slice %417 {offsets = [0, 16], sizes = [2, 16], strides = [1, 1]} : vector<2x32xf32> to vector<2x16xf32>
    %c0_75 = arith.constant 0 : index
    %c16_76 = arith.constant 16 : index
    %421 = vector.load %arg18[%c0_75, %c16_76] : memref<16x32xf32, #tpu.memory_space<vmem>>, vector<2x16xf32>
    tpu.vector_store %arg18[%c0_75, %c16_76], %420 {strides = array<i32>} : memref<16x32xf32, #tpu.memory_space<vmem>>, vector<2x16xf32>,
    %422 = arith.subf %403, %373 : vector<2x32xf32>
    %423 = arith.mulf %416, %422 : vector<2x32xf32>
    %424 = arith.addf %373, %423 : vector<2x32xf32>
    %c0_77 = arith.constant 0 : index
    %c0_78 = arith.constant 0 : index
    %425 = vector.load %arg17[%c0_77, %c0_78] : memref<2x32xf32, #tpu.memory_space<vmem>>, vector<2x32xf32>
    tpu.vector_store %arg17[%c0_77, %c0_78], %424 {strides = array<i32>} : memref<2x32xf32, #tpu.memory_space<vmem>>, vector<2x32xf32>,
    %c0_79 = arith.constant 0 : index
    %c0_80 = arith.constant 0 : index
    %426 = vector.load %arg18[%c0_79, %c0_80] : memref<16x32xf32, #tpu.memory_space<vmem>>, vector<16x32xf32>
    %c0_81 = arith.constant 0 : index
    %c0_82 = arith.constant 0 : index
    %427 = vector.load %arg8[%c0_81, %c0_82] : memref<1x32xf32, #tpu.memory_space<vmem>>, vector<1x32xf32>
    %c0_83 = arith.constant 0 : index
    %c0_84 = arith.constant 0 : index
    %428 = vector.load %arg9[%c0_83, %c0_84] : memref<1x32xf32, #tpu.memory_space<vmem>>, vector<1x32xf32>
    %cst_85 = arith.constant dense<0.000000e+00> : vector<16xf32>
    %429 = vector.multi_reduction <add>, %426, %cst_85 [1] : vector<16x32xf32> to vector<16xf32>
    %430 = vector.shape_cast %429 : vector<16xf32> to vector<16x1xf32>
    %cst_86 = arith.constant 3.200000e+01 : f32
    %431 = vector.broadcast %cst_86 : f32 to vector<16x1xf32>
    %432 = arith.divf %430, %431 : vector<16x1xf32>
    %433 = vector.broadcast %432 : vector<16x1xf32> to vector<16x32xf32>
    %434 = arith.subf %426, %433 : vector<16x32xf32>
    %435 = arith.mulf %434, %434 : vector<16x32xf32>
    %cst_87 = arith.constant dense<0.000000e+00> : vector<16xf32>
    %436 = vector.multi_reduction <add>, %435, %cst_87 [1] : vector<16x32xf32> to vector<16xf32>
    %437 = vector.shape_cast %436 : vector<16xf32> to vector<16x1xf32>
    %cst_88 = arith.constant 3.200000e+01 : f32
    %438 = vector.broadcast %cst_88 : f32 to vector<16x1xf32>
    %439 = arith.divf %437, %438 : vector<16x1xf32>
    %440 = vector.broadcast %432 : vector<16x1xf32> to vector<16x32xf32>
    %441 = arith.subf %426, %440 : vector<16x32xf32>
    %cst_89 = arith.constant 9.99999974E-6 : f32
    %442 = vector.broadcast %cst_89 : f32 to vector<16x1xf32>
    %443 = arith.addf %439, %442 : vector<16x1xf32>
    %444 = math.rsqrt %443 : vector<16x1xf32>
    %445 = vector.broadcast %444 : vector<16x1xf32> to vector<16x32xf32>
    %446 = arith.mulf %441, %445 : vector<16x32xf32>
    %447 = vector.broadcast %427 : vector<1x32xf32> to vector<16x32xf32>
    %448 = arith.mulf %446, %447 : vector<16x32xf32>
    %449 = vector.broadcast %428 : vector<1x32xf32> to vector<16x32xf32>
    %450 = arith.addf %448, %449 : vector<16x32xf32>
    %c0_90 = arith.constant 0 : index
    %c0_91 = arith.constant 0 : index
    %451 = vector.load %arg10[%c0_90, %c0_91] : memref<32x96xf32, #tpu.memory_space<vmem>>, vector<32x96xf32>
    %cst_92 = arith.constant dense<0.000000e+00> : vector<16x96xf32>
    %452 = tpu.matmul %450, %451, %cst_92 {dimension_numbers = #tpu.dot_dimension_numbers<[1], [0], [0], [1], [0, 0, 1, 1], [], []>} : vector<16x32xf32>, vector<32x96xf32>, vector<16x96xf32> -> vector<16x96xf32>
    %c0_93 = arith.constant 0 : index
    %c0_94 = arith.constant 0 : index
    %453 = vector.load %arg11[%c0_93, %c0_94] : memref<1x96xf32, #tpu.memory_space<vmem>>, vector<1x96xf32>
    %454 = vector.broadcast %453 : vector<1x96xf32> to vector<16x96xf32>
    %455 = arith.addf %452, %454 : vector<16x96xf32>
    %456 = vector.extract_strided_slice %455 {offsets = [0, 0], sizes = [16, 32], strides = [1, 1]} : vector<16x96xf32> to vector<16x32xf32>
    %457 = vector.extract_strided_slice %455 {offsets = [0, 32], sizes = [16, 32], strides = [1, 1]} : vector<16x96xf32> to vector<16x32xf32>
    %458 = vector.extract_strided_slice %455 {offsets = [0, 64], sizes = [16, 32], strides = [1, 1]} : vector<16x96xf32> to vector<16x32xf32>
    %c0_95 = arith.constant 0 : index
    %c0_96 = arith.constant 0 : index
    %459 = vector.load %arg2[%c0_95, %c0_96] : memref<16x1xf32, #tpu.memory_space<vmem>>, vector<16x1xf32>
    %c0_97 = arith.constant 0 : index
    %c0_98 = arith.constant 0 : index
    %460 = vector.load %arg3[%c0_97, %c0_98] : memref<1x16xf32, #tpu.memory_space<vmem>>, vector<1x16xf32>
    %461 = vector.broadcast %459 : vector<16x1xf32> to vector<16x16xf32>
    %462 = vector.broadcast %460 : vector<1x16xf32> to vector<16x16xf32>
    %463 = arith.cmpf oeq, %461, %462 : vector<16x16xf32>
    %cst_99 = arith.constant 0.000000e+00 : f32
    %464 = vector.broadcast %cst_99 : f32 to vector<16x1xf32>
    %465 = arith.cmpf ogt, %459, %464 : vector<16x1xf32>
    %466 = vector.broadcast %465 : vector<16x1xi1> to vector<16x16xi1>
    %467 = arith.andi %463, %466 : vector<16x16xi1>
    %cst_100 = arith.constant 1.000000e+00 : f32
    %cst_101 = arith.constant 0.000000e+00 : f32
    %468 = vector.broadcast %cst_100 : f32 to vector<16x16xf32>
    %469 = vector.broadcast %cst_101 : f32 to vector<16x16xf32>
    %470 = arith.select %467, %468, %469 : vector<16x16xi1>, vector<16x16xf32>
    %cst_102 = arith.constant 1.000000e+00 : f32
    %471 = vector.broadcast %cst_102 : f32 to vector<16x16xf32>
    %472 = arith.subf %470, %471 : vector<16x16xf32>
    %cst_103 = arith.constant 1.000000e+08 : f32
    %473 = vector.broadcast %cst_103 : f32 to vector<16x16xf32>
    %474 = arith.mulf %472, %473 : vector<16x16xf32>
    %cst_104 = arith.constant 0.000000e+00 : f32
    %475 = vector.broadcast %cst_104 : f32 to vector<16x1xf32>
    %476 = arith.cmpf ogt, %459, %475 : vector<16x1xf32>
    %477 = arith.extui %476 : vector<16x1xi1> to vector<16x1xi32>
    %478 = arith.sitofp %477 : vector<16x1xi32> to vector<16x1xf32>
    %479 = vector.extract_strided_slice %456 {offsets = [0, 0], sizes = [16, 8], strides = [1, 1]} : vector<16x32xf32> to vector<16x8xf32>
    %480 = vector.extract_strided_slice %457 {offsets = [0, 0], sizes = [16, 8], strides = [1, 1]} : vector<16x32xf32> to vector<16x8xf32>
    %cst_105 = arith.constant dense<0.000000e+00> : vector<16x16xf32>
    %481 = tpu.matmul %479, %480, %cst_105 {dimension_numbers = #tpu.dot_dimension_numbers<[1], [1], [0], [0], [0, 0, 1, 0], [], []>} : vector<16x8xf32>, vector<16x8xf32>, vector<16x16xf32> -> vector<16x16xf32>
    %cst_106 = arith.constant 0.353553385 : f32
    %482 = vector.broadcast %cst_106 : f32 to vector<16x16xf32>
    %483 = arith.mulf %481, %482 : vector<16x16xf32>
    %484 = arith.addf %483, %474 : vector<16x16xf32>
    %cst_107 = arith.constant dense<0xFF800000> : vector<16xf32>
    %485 = vector.multi_reduction <maximumf>, %484, %cst_107 [1] : vector<16x16xf32> to vector<16xf32>
    %486 = vector.shape_cast %485 : vector<16xf32> to vector<16x1xf32>
    %487 = vector.broadcast %486 : vector<16x1xf32> to vector<16x16xf32>
    %488 = arith.subf %484, %487 : vector<16x16xf32>
    %489 = math.exp %488 : vector<16x16xf32>
    %cst_108 = arith.constant dense<0.000000e+00> : vector<16xf32>
    %490 = vector.multi_reduction <add>, %489, %cst_108 [1] : vector<16x16xf32> to vector<16xf32>
    %491 = vector.shape_cast %490 : vector<16xf32> to vector<16x1xf32>
    %492 = vector.broadcast %491 : vector<16x1xf32> to vector<16x16xf32>
    %493 = arith.divf %489, %492 : vector<16x16xf32>
    %494 = arith.mulf %493, %470 : vector<16x16xf32>
    %495 = vector.extract_strided_slice %458 {offsets = [0, 0], sizes = [16, 8], strides = [1, 1]} : vector<16x32xf32> to vector<16x8xf32>
    %cst_109 = arith.constant dense<0.000000e+00> : vector<16x8xf32>
    %496 = tpu.matmul %494, %495, %cst_109 {dimension_numbers = #tpu.dot_dimension_numbers<[1], [0], [0], [1], [0, 0, 1, 1], [], []>} : vector<16x16xf32>, vector<16x8xf32>, vector<16x8xf32> -> vector<16x8xf32>
    %497 = vector.extract_strided_slice %456 {offsets = [0, 8], sizes = [16, 8], strides = [1, 1]} : vector<16x32xf32> to vector<16x8xf32>
    %498 = vector.extract_strided_slice %457 {offsets = [0, 8], sizes = [16, 8], strides = [1, 1]} : vector<16x32xf32> to vector<16x8xf32>
    %cst_110 = arith.constant dense<0.000000e+00> : vector<16x16xf32>
    %499 = tpu.matmul %497, %498, %cst_110 {dimension_numbers = #tpu.dot_dimension_numbers<[1], [1], [0], [0], [0, 0, 1, 0], [], []>} : vector<16x8xf32>, vector<16x8xf32>, vector<16x16xf32> -> vector<16x16xf32>
    %cst_111 = arith.constant 0.353553385 : f32
    %500 = vector.broadcast %cst_111 : f32 to vector<16x16xf32>
    %501 = arith.mulf %499, %500 : vector<16x16xf32>
    %502 = arith.addf %501, %474 : vector<16x16xf32>
    %cst_112 = arith.constant dense<0xFF800000> : vector<16xf32>
    %503 = vector.multi_reduction <maximumf>, %502, %cst_112 [1] : vector<16x16xf32> to vector<16xf32>
    %504 = vector.shape_cast %503 : vector<16xf32> to vector<16x1xf32>
    %505 = vector.broadcast %504 : vector<16x1xf32> to vector<16x16xf32>
    %506 = arith.subf %502, %505 : vector<16x16xf32>
    %507 = math.exp %506 : vector<16x16xf32>
    %cst_113 = arith.constant dense<0.000000e+00> : vector<16xf32>
    %508 = vector.multi_reduction <add>, %507, %cst_113 [1] : vector<16x16xf32> to vector<16xf32>
    %509 = vector.shape_cast %508 : vector<16xf32> to vector<16x1xf32>
    %510 = vector.broadcast %509 : vector<16x1xf32> to vector<16x16xf32>
    %511 = arith.divf %507, %510 : vector<16x16xf32>
    %512 = arith.mulf %511, %470 : vector<16x16xf32>
    %513 = vector.extract_strided_slice %458 {offsets = [0, 8], sizes = [16, 8], strides = [1, 1]} : vector<16x32xf32> to vector<16x8xf32>
    %cst_114 = arith.constant dense<0.000000e+00> : vector<16x8xf32>
    %514 = tpu.matmul %512, %513, %cst_114 {dimension_numbers = #tpu.dot_dimension_numbers<[1], [0], [0], [1], [0, 0, 1, 1], [], []>} : vector<16x16xf32>, vector<16x8xf32>, vector<16x8xf32> -> vector<16x8xf32>
    %515 = vector.extract_strided_slice %456 {offsets = [0, 16], sizes = [16, 8], strides = [1, 1]} : vector<16x32xf32> to vector<16x8xf32>
    %516 = vector.extract_strided_slice %457 {offsets = [0, 16], sizes = [16, 8], strides = [1, 1]} : vector<16x32xf32> to vector<16x8xf32>
    %cst_115 = arith.constant dense<0.000000e+00> : vector<16x16xf32>
    %517 = tpu.matmul %515, %516, %cst_115 {dimension_numbers = #tpu.dot_dimension_numbers<[1], [1], [0], [0], [0, 0, 1, 0], [], []>} : vector<16x8xf32>, vector<16x8xf32>, vector<16x16xf32> -> vector<16x16xf32>
    %cst_116 = arith.constant 0.353553385 : f32
    %518 = vector.broadcast %cst_116 : f32 to vector<16x16xf32>
    %519 = arith.mulf %517, %518 : vector<16x16xf32>
    %520 = arith.addf %519, %474 : vector<16x16xf32>
    %cst_117 = arith.constant dense<0xFF800000> : vector<16xf32>
    %521 = vector.multi_reduction <maximumf>, %520, %cst_117 [1] : vector<16x16xf32> to vector<16xf32>
    %522 = vector.shape_cast %521 : vector<16xf32> to vector<16x1xf32>
    %523 = vector.broadcast %522 : vector<16x1xf32> to vector<16x16xf32>
    %524 = arith.subf %520, %523 : vector<16x16xf32>
    %525 = math.exp %524 : vector<16x16xf32>
    %cst_118 = arith.constant dense<0.000000e+00> : vector<16xf32>
    %526 = vector.multi_reduction <add>, %525, %cst_118 [1] : vector<16x16xf32> to vector<16xf32>
    %527 = vector.shape_cast %526 : vector<16xf32> to vector<16x1xf32>
    %528 = vector.broadcast %527 : vector<16x1xf32> to vector<16x16xf32>
    %529 = arith.divf %525, %528 : vector<16x16xf32>
    %530 = arith.mulf %529, %470 : vector<16x16xf32>
    %531 = vector.extract_strided_slice %458 {offsets = [0, 16], sizes = [16, 8], strides = [1, 1]} : vector<16x32xf32> to vector<16x8xf32>
    %cst_119 = arith.constant dense<0.000000e+00> : vector<16x8xf32>
    %532 = tpu.matmul %530, %531, %cst_119 {dimension_numbers = #tpu.dot_dimension_numbers<[1], [0], [0], [1], [0, 0, 1, 1], [], []>} : vector<16x16xf32>, vector<16x8xf32>, vector<16x8xf32> -> vector<16x8xf32>
    %533 = vector.extract_strided_slice %456 {offsets = [0, 24], sizes = [16, 8], strides = [1, 1]} : vector<16x32xf32> to vector<16x8xf32>
    %534 = vector.extract_strided_slice %457 {offsets = [0, 24], sizes = [16, 8], strides = [1, 1]} : vector<16x32xf32> to vector<16x8xf32>
    %cst_120 = arith.constant dense<0.000000e+00> : vector<16x16xf32>
    %535 = tpu.matmul %533, %534, %cst_120 {dimension_numbers = #tpu.dot_dimension_numbers<[1], [1], [0], [0], [0, 0, 1, 0], [], []>} : vector<16x8xf32>, vector<16x8xf32>, vector<16x16xf32> -> vector<16x16xf32>
    %cst_121 = arith.constant 0.353553385 : f32
    %536 = vector.broadcast %cst_121 : f32 to vector<16x16xf32>
    %537 = arith.mulf %535, %536 : vector<16x16xf32>
    %538 = arith.addf %537, %474 : vector<16x16xf32>
    %cst_122 = arith.constant dense<0xFF800000> : vector<16xf32>
    %539 = vector.multi_reduction <maximumf>, %538, %cst_122 [1] : vector<16x16xf32> to vector<16xf32>
    %540 = vector.shape_cast %539 : vector<16xf32> to vector<16x1xf32>
    %541 = vector.broadcast %540 : vector<16x1xf32> to vector<16x16xf32>
    %542 = arith.subf %538, %541 : vector<16x16xf32>
    %543 = math.exp %542 : vector<16x16xf32>
    %cst_123 = arith.constant dense<0.000000e+00> : vector<16xf32>
    %544 = vector.multi_reduction <add>, %543, %cst_123 [1] : vector<16x16xf32> to vector<16xf32>
    %545 = vector.shape_cast %544 : vector<16xf32> to vector<16x1xf32>
    %546 = vector.broadcast %545 : vector<16x1xf32> to vector<16x16xf32>
    %547 = arith.divf %543, %546 : vector<16x16xf32>
    %548 = arith.mulf %547, %470 : vector<16x16xf32>
    %549 = vector.extract_strided_slice %458 {offsets = [0, 24], sizes = [16, 8], strides = [1, 1]} : vector<16x32xf32> to vector<16x8xf32>
    %cst_124 = arith.constant dense<0.000000e+00> : vector<16x8xf32>
    %550 = tpu.matmul %548, %549, %cst_124 {dimension_numbers = #tpu.dot_dimension_numbers<[1], [0], [0], [1], [0, 0, 1, 1], [], []>} : vector<16x16xf32>, vector<16x8xf32>, vector<16x8xf32> -> vector<16x8xf32>
    %551 = tpu.concatenate %496, %514, %532, %550 in 1 : vector<16x8xf32>, vector<16x8xf32>, vector<16x8xf32>, vector<16x8xf32> -> vector<16x32xf32>
    %c0_125 = arith.constant 0 : index
    %c0_126 = arith.constant 0 : index
    %552 = vector.load %arg12[%c0_125, %c0_126] : memref<32x32xf32, #tpu.memory_space<vmem>>, vector<32x32xf32>
    %cst_127 = arith.constant dense<0.000000e+00> : vector<16x32xf32>
    %553 = tpu.matmul %551, %552, %cst_127 {dimension_numbers = #tpu.dot_dimension_numbers<[1], [0], [0], [1], [0, 0, 1, 1], [], []>} : vector<16x32xf32>, vector<32x32xf32>, vector<16x32xf32> -> vector<16x32xf32>
    %c0_128 = arith.constant 0 : index
    %c0_129 = arith.constant 0 : index
    %554 = vector.load %arg13[%c0_128, %c0_129] : memref<1x32xf32, #tpu.memory_space<vmem>>, vector<1x32xf32>
    %555 = vector.broadcast %554 : vector<1x32xf32> to vector<16x32xf32>
    %556 = arith.addf %553, %555 : vector<16x32xf32>
    %557 = vector.broadcast %478 : vector<16x1xf32> to vector<16x32xf32>
    %558 = arith.mulf %556, %557 : vector<16x32xf32>
    %559 = arith.addf %450, %558 : vector<16x32xf32>
    %c0_130 = arith.constant 0 : index
    %c0_131 = arith.constant 0 : index
    %560 = vector.load %arg14[%c0_130, %c0_131] : memref<1x32xf32, #tpu.memory_space<vmem>>, vector<1x32xf32>
    %c0_132 = arith.constant 0 : index
    %c0_133 = arith.constant 0 : index
    %561 = vector.load %arg15[%c0_132, %c0_133] : memref<1x32xf32, #tpu.memory_space<vmem>>, vector<1x32xf32>
    %cst_134 = arith.constant dense<0.000000e+00> : vector<16xf32>
    %562 = vector.multi_reduction <add>, %559, %cst_134 [1] : vector<16x32xf32> to vector<16xf32>
    %563 = vector.shape_cast %562 : vector<16xf32> to vector<16x1xf32>
    %cst_135 = arith.constant 3.200000e+01 : f32
    %564 = vector.broadcast %cst_135 : f32 to vector<16x1xf32>
    %565 = arith.divf %563, %564 : vector<16x1xf32>
    %566 = vector.broadcast %565 : vector<16x1xf32> to vector<16x32xf32>
    %567 = arith.subf %559, %566 : vector<16x32xf32>
    %568 = arith.mulf %567, %567 : vector<16x32xf32>
    %cst_136 = arith.constant dense<0.000000e+00> : vector<16xf32>
    %569 = vector.multi_reduction <add>, %568, %cst_136 [1] : vector<16x32xf32> to vector<16xf32>
    %570 = vector.shape_cast %569 : vector<16xf32> to vector<16x1xf32>
    %cst_137 = arith.constant 3.200000e+01 : f32
    %571 = vector.broadcast %cst_137 : f32 to vector<16x1xf32>
    %572 = arith.divf %570, %571 : vector<16x1xf32>
    %573 = vector.broadcast %565 : vector<16x1xf32> to vector<16x32xf32>
    %574 = arith.subf %559, %573 : vector<16x32xf32>
    %cst_138 = arith.constant 9.99999974E-6 : f32
    %575 = vector.broadcast %cst_138 : f32 to vector<16x1xf32>
    %576 = arith.addf %572, %575 : vector<16x1xf32>
    %577 = math.rsqrt %576 : vector<16x1xf32>
    %578 = vector.broadcast %577 : vector<16x1xf32> to vector<16x32xf32>
    %579 = arith.mulf %574, %578 : vector<16x32xf32>
    %580 = vector.broadcast %560 : vector<1x32xf32> to vector<16x32xf32>
    %581 = arith.mulf %579, %580 : vector<16x32xf32>
    %582 = vector.broadcast %561 : vector<1x32xf32> to vector<16x32xf32>
    %583 = arith.addf %581, %582 : vector<16x32xf32>
    %c0_139 = arith.constant 0 : index
    %c0_140 = arith.constant 0 : index
    %584 = vector.load %arg16[%c0_139, %c0_140] : memref<16x32xf32, #tpu.memory_space<vmem>>, vector<16x32xf32>
    tpu.vector_store %arg16[%c0_139, %c0_140], %583 {strides = array<i32>} : memref<16x32xf32, #tpu.memory_space<vmem>>, vector<16x32xf32>,
    return
  }
}

</mosaic_0001>

<bundles_post_ra>
// kernel: tpu_custom_call.1
= control target key start
LH: loop header
LB: loop body
LE: loop exit
PB: predicated region body
PF: predicated region fallthrough
CT: control target
= control target key end

     0   :  { %s2811_s0 = inlined_call_operand.vmem [shape: f32[16,64], index: 0, kind: input, shape index: {}]   ;;  %s2812_s1 = inlined_call_operand.vmem [shape: s32[2,1], index: 1, kind: input, shape index: {}]   ;;  %s2813_s2 = inlined_call_operand.vmem [shape: f32[16,1], index: 2, kind: input, shape index: {}]   ;;  %s2814_s3 = inlined_call_operand.vmem [shape: f32[1,16], index: 3, kind: input, shape index: {}]   ;;  %s2815_s4 = inlined_call_operand.hbm [shape: f32[64,96], index: 4, kind: input, shape index: {}]   ;;  %s2816_s5 = inlined_call_operand.vmem [shape: f32[1,96], index: 5, kind: input, shape index: {}]   ;;  %s2817_s6 = inlined_call_operand.hbm [shape: f32[32,96], index: 6, kind: input, shape index: {}]   ;;  %s2818_s7 = inlined_call_operand.vmem [shape: f32[1,96], index: 7, kind: input, shape index: {}]   ;;  %s2819_s8 = inlined_call_operand.vmem [shape: f32[1,32], index: 8, kind: input, shape index: {}]   ;;  %s2820_s9 = inlined_call_operand.vmem [shape: f32[1,32], index: 9, kind: input, shape index: {}]   ;;  %s2821_s10 = inlined_call_operand.hbm [shape: f32[32,96], index: 10, kind: input, shape index: {}]   ;;  %s2822_s11 = inlined_call_operand.vmem [shape: f32[1,96], index: 11, kind: input, shape index: {}]   ;;  %s2823_s12 = inlined_call_operand.hbm [shape: f32[32,32], index: 12, kind: input, shape index: {}]   ;;  %s2824_s13 = inlined_call_operand.vmem [shape: f32[1,32], index: 13, kind: input, shape index: {}]   ;;  %s2825_s14 = inlined_call_operand.vmem [shape: f32[1,32], index: 14, kind: input, shape index: {}]   ;;  %s2826_s15 = inlined_call_operand.vmem [shape: f32[1,32], index: 15, kind: input, shape index: {}]   ;;  %s2827_s16 = inlined_call_operand.hbm [shape: f32[16,32], index: 16, kind: output, shape index: {0}]   ;;  %s2828_s17 = inlined_call_operand.hbm [shape: f32[2,32], index: 17, kind: output, shape index: {1}]  }
   0x1   :  { %2830 = sst [smem:[#allocation19_spill]] %s2811_s0 }
   0x2   :  { %2831 = sst [smem:[#allocation20_spill]] %s2812_s1 }
   0x3   :  { %23 = vsyncpa [#allocation4], 0 }
   0x4   :  { %24 = vsyncpa [#allocation7], 0 }
   0x5   :  { %25 = vsyncpa [#allocation10], 0 }
   0x6   :  { %26 = vsyncpa [#allocation5], 0 }
   0x7   :  { %27 = vsyncpa [#allocation13], 0  ;;  %s55_s26 = sshll.u32 %s2817_s6, 4  ;;  %s2142_s27 = smov [#allocation6]   ;;  %s56_s26 = int_to_ptr.hbm [resolvable:$true] %s55_s26 }
   0x8   :  { %s57_s28 = sshll.u32 %s2142_s27, 4  ;;  %s40_s30 = sshll.u32 %s2815_s4, 4  ;;  %s58_s28 = int_to_ptr.vmem [resolvable:$true] %s57_s28  ;;  %s41_s30 = int_to_ptr.hbm [resolvable:$true] %s40_s30 }
   0x9   :  { %s2143_s18 = smov 128   ;;  %s2144_s19 = smov 8  }
   0xa   :  { %63 = dma.hbm_to_vmem [thread:$0]  %s56_s26, 512, %s58_s28, [#allocation7], %s2143_s18, %s2143_s18, %s2144_s19  }
   0xb   :  { %s2145_s1 = smov [#allocation3]   ;;  %s74_s6 = sshll.u32 %s2821_s10, 4  ;;  %s75_s6 = int_to_ptr.hbm [resolvable:$true] %s74_s6 }
   0xc   :  { %s42_s20 = sshll.u32 %s2145_s1, 4  ;;  %s89_s24 = sshll.u32 %s2823_s12, 4  ;;  %s43_s20 = int_to_ptr.vmem [resolvable:$true] %s42_s20  ;;  %s90_s24 = int_to_ptr.hbm [resolvable:$true] %s89_s24 }
   0xd   :  { %48 = dma.hbm_to_vmem [thread:$0]  %s41_s30, 1024, %s43_s20, [#allocation4], %s2143_s18, %s2143_s18, %s2144_s19  }
   0xe   :  { %s2146_s25 = smov [#allocation8]   ;;  %s2147_s26 = smov [#allocation9]  }
   0xf   :  { %s76_s27 = sshll.u32 %s2146_s25, 4  ;;  %s91_s10 = sshll.u32 %s2147_s26, 4  ;;  %s77_s27 = int_to_ptr.vmem [resolvable:$true] %s76_s27  ;;  %s92_s10 = int_to_ptr.vmem [resolvable:$true] %s91_s10 }
  0x10   :  { %82 = dma.hbm_to_vmem [thread:$0]  %s75_s6, 512, %s77_s27, [#allocation7], %s2143_s18, %s2143_s18, %s2144_s19  }
  0x11   :  { %97 = dma.hbm_to_vmem [thread:$0]  %s90_s24, 512, %s92_s10, [#allocation10], %s2143_s18, %s2143_s18, %s2144_s19  }
  0x12   :  { %2132 = dma.done.wait [#allocation4], 1024  }
  0x13   :  { %2133 = vsyncadd [#allocation4], 4294966272 }
  0x14   :  { %2134 = dma.done.wait [#allocation7], 1024  }
  0x15   :  { %2135 = vsyncadd [#allocation7], 4294966272 }
  0x16   :  { %2136 = dma.done.wait [#allocation10], 512  }
  0x17   :  { %2137 = vsyncadd [#allocation10], 4294966784  ;;  %v130_v0 = vld [vmem:[#allocation3 + $0x38] sm:$0xff]  ;;  %v129_v2 = vld [vmem:[#allocation3 + $0x30] sm:$0xff]  ;;  %v2148_v9 = vmov 0.0   ;;  %s2832_s29 = sld [smem:[#allocation19_spill]]  ;;  %v170_v49 = vlaneseq }
  0x18   :  { %v2281_v1 = vld [vmem:[#allocation6 + $0x18] sm:$0xff]  ;;  %150 = vmatpush.msra.mxu0 %v130_v0  ;;  %v2284_v3 = vld [vmem:[#allocation6 + $0x10] sm:$0xff]  ;;  %v128_v4 = vld [vmem:[#allocation3 + $0x28] sm:$0xff]  ;;  %vm135_vm0 = vcmask 523264   ;;  %s2149_s1 = smov 64   ;;  %v2150_v36 = vmov 0  }
  0x19   :  { %195 = vmatpush.msra.mxu1 %v2281_v1  ;;  %v2286_v5 = vld [vmem:[#allocation6 + $0x8] sm:$0xff]  ;;  %286 = vmatpush.msra.mxu2 %v2281_v1  ;;  %v127_v6 = vld [vmem:[#allocation3 + $0x20] sm:$0xff]  ;;  %v126_v8 = vld [vmem:[#allocation3 + $0x18] sm:$0xff]  ;;  %s2833_s22 = sld [smem:[#allocation20_spill]]  ;;  %s2151_s6 = smov 96   ;;  %v171_v50 = vand.u32 127, %v170_v49 }
  0x1a   :  { %389 = vmatpush.msra.mxu3 %v2281_v1  ;;  %151 = vmatpush.msra.mxu0 %v129_v2  ;;  %v2291_v7 = vld [vmem:[#allocation6] sm:$0xff]  ;;  %v125_v10 = vld [vmem:[#allocation3 + $0x10] sm:$0xff]  ;;  %v124_v11 = vld [vmem:[#allocation3 + $0x8] sm:$0xff]  ;;  %vm179_vm8 = vcmask 261120   ;;  %vm266_vm9 = vcmask 123904   ;;  %vm268_vm10 = vcmask 255104  }
  0x1b   :  { %196 = vmatpush.msra.mxu1 %v2284_v3  ;;  %287 = vmatpush.msra.mxu2 %v2284_v3  ;;  %v123_v12 = vld [vmem:[#allocation3] sm:$0xff]  ;;  %v2325_v14 = vld [vmem:[%s2818_s7] ss:$0 sm:$0xff]  ;;  %vm172_vm7 = vcmp.lt.s32.totalorder %v171_v50, 16  ;;  %s2152_s4 = smov 32   ;;  %s2155_s28 = smov 88  }
  0x1c   :  { %390 = vmatpush.msra.mxu3 %v2284_v3  ;;  %152 = vmatpush.msra.mxu0 %v128_v4  ;;  %v2332_v17 = vld [vmem:[%s2816_s5] ss:$0 sm:$0xff]  ;;  %v2355_v51 = vsel %vm172_vm7, 1.0, %v2148_v9  ;;  %s2158_s0 = smov 80   ;;  %s2159_s7 = smov 112  }
  0x1d   :  { %197 = vmatpush.msra.mxu1 %v2286_v5  ;;  %288 = vmatpush.msra.mxu2 %v2286_v5  ;;  %v121_v13 = vld [vmem:[%s2832_s29] sm:$0xff]  ;;  %v2358_v53 = vsub.f32 1.0, %v2355_v51  ;;  %s2163_s23 = smov 16   ;;  %s2164_s24 = smov 24  }
  0x1e   :  { %391 = vmatpush.msra.mxu3 %v2286_v5  ;;  %153 = vmatpush.msra.mxu0 %v127_v6  ;;  %s1725_s30 = sshll.u32 %s2827_s16, 4  ;;  %s1726_s30 = int_to_ptr.hbm [resolvable:$true] %s1725_s30 }
  0x1f   :  { %198 = vmatpush.msra.mxu1 %v2291_v7  ;;  %289 = vmatpush.msra.mxu2 %v2291_v7  ;;  %v2346_v39 = vld [vmem:[%s2833_s22] sm:$0x3] }
  0x20   :  { %199 = vmatmul.f32.vlgmr.msra.gmra.mxu1 %v2148_v9  ;;  %154 = vmatpush.msra.mxu0 %v126_v8  ;;  %vm242_vm5 = vcmp.gt.s32.totalorder %v2346_v39, 0  ;;  %vm245_vm6 = vcmp.gt.s32.totalorder %v2346_v39, 7  ;;  %vm339_vm15 = vcmp.gt.s32.totalorder %v2346_v39, 1  ;;  %vm445_vm7 = vcmp.gt.s32.totalorder %v2346_v39, 5 }
  0x21   :  { %392 = vmatpush.msra.mxu3 %v2291_v7  ;;  %492 = vmatpush.msrb.mxu1 %v2281_v1  ;;  %v1760_v41 = vsel %vm242_vm5, 1.0, %v2148_v9  ;;  %v1761_v42 = vsel %vm245_vm6, 1.0, %v2148_v9  ;;  %vm442_vm6 = vcmp.gt.s32.totalorder %v2346_v39, 2 }
  0x22   :  { %595 = vmatpush.msrb.mxu2 %v2281_v1  ;;  %155 = vmatpush.msra.mxu0 %v125_v10  ;;  %v1842_v43 = vpack.i.bf16 %v1761_v42, %v1760_v41 }
  0x23   :  { %677 = vmatpush.msrb.mxu3 %v2281_v1  ;;  %493 = vmatpush.msrb.mxu1 %v2284_v3 }
  0x24   :  { %596 = vmatpush.msrb.mxu2 %v2284_v3  ;;  %156 = vmatpush.msra.mxu0 %v124_v11 }
  0x25   :  { %678 = vmatpush.msrb.mxu3 %v2284_v3  ;;  %494 = vmatpush.msrb.mxu1 %v2286_v5 }
  0x26   :  { %597 = vmatpush.msrb.mxu2 %v2286_v5  ;;  %157 = vmatpush.msra.mxu0 %v123_v12 }
  0x27   :  { %679 = vmatpush.msrb.mxu3 %v2286_v5  ;;  %1756 = vmatmul.msk.f32.vlgmr.msra.gmra.mxu0 %vm135_vm0, %v121_v13 }
  0x28   :  { %495 = vmatpush.msrb.mxu1 %v2291_v7  ;;  %598 = vmatpush.msrb.mxu2 %v2291_v7 }
  0x29   :  { %680 = vmatpush.msrb.mxu3 %v2291_v7  ;;  %1841 = vset.pattern.permute.xlu1 %v2150_v36 }
  0x2a   :  { %764 = vmatpush.msra.mxu1 %v2281_v1  ;;  %1847 = vset.pattern.permute.xlu0 %v2150_v36 }
  0x2b   :  { %1863 = vset.pattern.permute.xlu2 %v2150_v36 }
  0x2c   :  { %765 = vmatpush.msra.mxu1 %v2284_v3 }
  0x2e   :  { %766 = vmatpush.msra.mxu1 %v2286_v5 }
  0x30   :  { %767 = vmatpush.msra.mxu1 %v2291_v7 }
  0x9d   :  { %v200_v15 = vpop.f32.mrf.mxu1 }
  0x9e   :  { %v201_v16 = vadd.f32 %v2325_v14, %v200_v15 }
  0xa0   :  { %224 = vrot.lane.b32.xlu0 %v201_v16, %s2149_s1 }
  0xa4   :  { %v159_v18 = vpop.f32.mrf.mxu0 }
  0xa5   :  { %v2335_v19 = vadd.f32 %v2332_v17, %v159_v18 }
  0xa7   :  { %v203_v20 = vadd.f32 %v201_v16, %v2335_v19 }
  0xa9   :  { %v1759_v21 = vmul.f32 -1.442695, %v203_v20 }
  0xab   :  { %1898 = vpow2.f32 %v1759_v21 }
  0xb1   :  { %v1899_v22 = vpop.eup %1898 }
  0xb2   :  { %v207_v23 = vadd.f32 1.0, %v1899_v22 }
  0xb4   :  { %1900 = vrcp.f32 %v207_v23  ;;  %v219_v29 = vand.u32 2147483648, %v207_v23  ;;  %vm213_vm2 = vweird.f32 %v207_v23  ;;  %v217_v30 = vand.u32 2147483647, %v207_v23 }
  0xb6   :  { %v220_v32 = vor.u32 1.1754944e-38, %v219_v29  ;;  %vm218_vm4 = vcmp.eq.f32.partialorder %v217_v30, 8.507059e+37 }
  0xba   :  { %v1901_v24 = vpop.eup %1900 }
  0xbb   :  { %v209_v25 = vmul.f32 %v1901_v24, %v207_v23  ;;  %vm214_vm1 = vweird.f32 %v1901_v24 }
  0xbc   :  { %vm215_vm3 = vmor %vm213_vm2, %vm214_vm1  ;;  %vm342_vm1 = vcmp.gt.s32.totalorder %v2346_v39, 6 }
  0xbd   :  { %v210_v26 = vsub.f32 1.0, %v209_v25 }
  0xbf   :  { %v211_v27 = vmul.f32 %v1901_v24, %v210_v26 }
  0xc1   :  { %v212_v28 = vadd.f32 %v1901_v24, %v211_v27  ;;  %v1764_v27 = vsel %vm339_vm15, 1.0, %v2148_v9  ;;  %vm545_vm15 = vcmp.gt.s32.totalorder %v2346_v39, 3 }
  0xc3   :  { %v216_v31 = vsel %vm215_vm3, %v1901_v24, %v212_v28  ;;  %v1765_v28 = vsel %vm342_vm1, 1.0, %v2148_v9  ;;  %vm548_vm1 = vcmp.gt.s32.totalorder %v2346_v39, 4 }
  0xc4   :  { %v221_v34 = vsel %vm218_vm4, %v220_v32, %v216_v31  ;;  %v1848_v29 = vpack.i.bf16 %v1765_v28, %v1764_v27 }
  0xc5   :  { %v234_v44 = vsub.f32 1.0, %v221_v34  ;;  %v240_v47 = vmul.f32 0.0, %v221_v34 }
 0x112   :  { %v225_v33 = vpop.permute.xlu0 %224 }
 0x113   :  { %v227_v35 = vmul.f32 %v225_v33, %v221_v34 }
 0x115   :  { %229 = vrot.lane.b32.xlu0 %v227_v35, %s2149_s1 }
 0x187   :  { %v230_v37 = vpop.permute.xlu0 %229 }
 0x188   :  { %v232_v38 = vadd.f32 %v230_v37, %v2335_v19 }
 0x18a   :  { %1902 = vtanh.f32 %v232_v38 }
 0x190   :  { %v1903_v40 = vpop.eup %1902 }
 0x191   :  { %236 = vrot.lane.b32.xlu1 %v1903_v40, %s2151_s6 }
 0x199   :  { %1843 = vperm.xlu1 %1841, %v1842_v43  }
 0x203   :  { %v237_v45 = vpop.permute.xlu1 %236 }
 0x204   :  { %v239_v46 = vmul.f32 %v237_v45, %v234_v44 }
 0x206   :  { %v241_v48 = vadd.f32 %v240_v47, %v239_v46 }
 0x208   :  { %262 = vrot.lane.b32.xlu2 %v241_v48, %s2151_s6 }
 0x20b   :  { %v1844_v52 = vpop.permute.xlu1 %1843 }
 0x20c   :  { %v1846_v54 = vunpack.i.h.bf16 %v1844_v52  ;;  %v1845_v55 = vunpack.i.l.bf16 %v1844_v52 }
 0x20e   :  { %v904_v56 = vmul.f32 %v1846_v54, %v2355_v51  ;;  %v905_v57 = vmul.f32 %v1845_v55, %v2358_v53  ;;  %v259_v59 = vmul.f32 %v1846_v54, %v2358_v53  ;;  %v253_v60 = vmul.f32 %v1845_v55, %v2355_v51 }
 0x210   :  { %v2362_v58 = vadd.f32 %v905_v57, %v904_v56  ;;  %v260_v61 = vadd.f32 %v259_v59, %v253_v60 }
 0x262   :  { %v263_v62 = vpop.permute.xlu2 %262 }
 0x263   :  { %v2366_v63 = vmul.f32 %v263_v62, %v260_v61 }
 0x265   :  { %1762 = vmatmul.msk.f32.vlgmr.msra.gmra.mxu2 %vm179_vm8, %v2366_v63  ;;  %267 = vst.msk [vmem:[#allocation2] sm:$0x3] %vm266_vm9, %v2366_v63  ;;  %v333_v6 = vrot.slane %v2366_v63, 6 }
 0x266   :  { %851 = vmatpush.msra.mxu2 %v2281_v1  ;;  %269 = vst.msk [vmem:[#allocation2 + $0xe] sm:$0x3] %vm268_vm10, %v2366_v63 }
 0x268   :  { %852 = vmatpush.msra.mxu2 %v2284_v3 }
 0x26a   :  { %853 = vmatpush.msra.mxu2 %v2286_v5 }
 0x26c   :  { %854 = vmatpush.msra.mxu2 %v2291_v7 }
 0x2e8   :  { %v291_v0 = vpop.f32.mrf.mxu2 }
 0x2e9   :  { %v292_v2 = vadd.f32 %v2325_v14, %v291_v0 }
 0x2eb   :  { %v295_v4 = vrot.slane %v292_v2, 6 }
 0x2ed   :  { %317 = vrot.lane.b32.xlu2 %v295_v4, %s2149_s1  ;;  %v297_v1 = vadd.f32 %v295_v4, %v2335_v19 }
 0x2ef   :  { %v1763_v8 = vmul.f32 -1.442695, %v297_v1 }
 0x2f1   :  { %1904 = vpow2.f32 %v1763_v8 }
 0x2f5   :  { %334 = vrot.lane.b32.xlu2 %v333_v6, %s2152_s4 }
 0x2f7   :  { %v1905_v3 = vpop.eup %1904 }
 0x2f8   :  { %v301_v10 = vadd.f32 1.0, %v1905_v3 }
 0x2fa   :  { %1906 = vrcp.f32 %v301_v10  ;;  %v313_v15 = vand.u32 2147483648, %v301_v10  ;;  %vm307_vm12 = vweird.f32 %v301_v10  ;;  %v311_v16 = vand.u32 2147483647, %v301_v10 }
 0x2fc   :  { %v314_v20 = vor.u32 1.1754944e-38, %v313_v15  ;;  %vm312_vm14 = vcmp.eq.f32.partialorder %v311_v16, 8.507059e+37 }
 0x300   :  { %v1907_v5 = vpop.eup %1906 }
 0x301   :  { %v303_v7 = vmul.f32 %v1907_v5, %v301_v10  ;;  %vm308_vm11 = vweird.f32 %v1907_v5 }
 0x302   :  { %vm309_vm13 = vmor %vm307_vm12, %vm308_vm11 }
 0x303   :  { %v304_v11 = vsub.f32 1.0, %v303_v7 }
 0x305   :  { %v305_v12 = vmul.f32 %v1907_v5, %v304_v11 }
 0x307   :  { %v306_v13 = vadd.f32 %v1907_v5, %v305_v12  ;;  %v1768_v12 = vsel %vm442_vm6, 1.0, %v2148_v9 }
 0x309   :  { %v310_v18 = vsel %vm309_vm13, %v1907_v5, %v306_v13  ;;  %v1769_v13 = vsel %vm445_vm7, 1.0, %v2148_v9 }
 0x30a   :  { %v315_v22 = vsel %vm312_vm14, %v314_v20, %v310_v18  ;;  %v1853_v15 = vpack.i.bf16 %v1769_v13, %v1768_v12 }
 0x30b   :  { %v327_v31 = vsub.f32 1.0, %v315_v22 }
 0x347   :  { %v318_v21 = vpop.permute.xlu2 %317 }
 0x348   :  { %v320_v23 = vmul.f32 %v318_v21, %v315_v22 }
 0x34a   :  { %322 = vrot.lane.b32.xlu0 %v320_v23, %s2149_s1 }
 0x34f   :  { %v335_v30 = vpop.permute.xlu2 %334 }
 0x350   :  { %v337_v33 = vmul.f32 %v335_v30, %v315_v22 }
 0x352   :  { %1849 = vperm.xlu0 %1847, %v1848_v29  }
 0x3bc   :  { %v323_v24 = vpop.permute.xlu0 %322 }
 0x3bd   :  { %v325_v25 = vadd.f32 %v323_v24, %v2335_v19 }
 0x3bf   :  { %1908 = vtanh.f32 %v325_v25 }
 0x3c4   :  { %v1850_v40 = vpop.permute.xlu0 %1849 }
 0x3c5   :  { %v1909_v26 = vpop.eup %1908  ;;  %v1852_v41 = vunpack.i.h.bf16 %v1850_v40  ;;  %v1851_v42 = vunpack.i.l.bf16 %v1850_v40 }
 0x3c6   :  { %329 = vrot.lane.b32.xlu1 %v1909_v26, %s2151_s6 }
 0x3c7   :  { %v817_v43 = vmul.f32 %v1852_v41, %v2355_v51  ;;  %v818_v44 = vmul.f32 %v1851_v42, %v2358_v53  ;;  %v356_v46 = vmul.f32 %v1852_v41, %v2358_v53  ;;  %v350_v47 = vmul.f32 %v1851_v42, %v2355_v51 }
 0x3c9   :  { %v2396_v45 = vadd.f32 %v818_v44, %v817_v43  ;;  %v2400_v48 = vadd.f32 %v356_v46, %v350_v47 }
 0x438   :  { %v330_v32 = vpop.permute.xlu1 %329 }
 0x439   :  { %v332_v34 = vmul.f32 %v330_v32, %v327_v31 }
 0x43b   :  { %v2390_v35 = vadd.f32 %v337_v33, %v332_v34 }
 0x43d   :  { %v366_v37 = vsub.f32 %v2390_v35, %v335_v30 }
 0x43f   :  { %v368_v38 = vrot.slane %v366_v37, 2 }
 0x441   :  { %369 = vrot.lane.b32.xlu1 %v368_v38, %s2151_s6 }
 0x4b3   :  { %v370_v49 = vpop.permute.xlu1 %369 }
 0x4b4   :  { %v372_v50 = vmul.f32 %v370_v49, %v2400_v48 }
 0x4b6   :  { %v373_v52 = vadd.f32 %v372_v50, %v2366_v63 }
 0x4b8   :  { %1766 = vmatmul.msk.f32.vlgmr.msra.gmra.mxu3 %vm179_vm8, %v373_v52  ;;  %v436_v54 = vrot.slane %v373_v52, 4 }
 0x4ba   :  { %437 = vrot.lane.b32.xlu0 %v436_v54, %s2152_s4 }
 0x52c   :  { %v438_v28 = vpop.permute.xlu0 %437 }
 0x53b   :  { %v394_v55 = vpop.f32.mrf.mxu3 }
 0x53c   :  { %v395_v56 = vadd.f32 %v2325_v14, %v394_v55 }
 0x53e   :  { %v398_v57 = vrot.slane %v395_v56, 4 }
 0x540   :  { %420 = vrot.lane.b32.xlu2 %v398_v57, %s2149_s1  ;;  %v400_v59 = vadd.f32 %v398_v57, %v2335_v19 }
 0x542   :  { %v1767_v60 = vmul.f32 -1.442695, %v400_v59 }
 0x544   :  { %1910 = vpow2.f32 %v1767_v60 }
 0x54a   :  { %v1911_v61 = vpop.eup %1910 }
 0x54b   :  { %v404_v62 = vadd.f32 1.0, %v1911_v61 }
 0x54d   :  { %1912 = vrcp.f32 %v404_v62  ;;  %v416_v1 = vand.u32 2147483648, %v404_v62  ;;  %vm410_vm3 = vweird.f32 %v404_v62  ;;  %v414_v8 = vand.u32 2147483647, %v404_v62 }
 0x54f   :  { %v417_v10 = vor.u32 1.1754944e-38, %v416_v1  ;;  %vm415_vm5 = vcmp.eq.f32.partialorder %v414_v8, 8.507059e+37  ;;  %v1772_v8 = vsel %vm545_vm15, 1.0, %v2148_v9 }
 0x553   :  { %v1913_v0 = vpop.eup %1912 }
 0x554   :  { %v406_v63 = vmul.f32 %v1913_v0, %v404_v62  ;;  %vm411_vm2 = vweird.f32 %v1913_v0 }
 0x555   :  { %vm412_vm4 = vmor %vm410_vm3, %vm411_vm2 }
 0x556   :  { %v407_v2 = vsub.f32 1.0, %v406_v63 }
 0x558   :  { %v408_v4 = vmul.f32 %v1913_v0, %v407_v2 }
 0x55a   :  { %v409_v6 = vadd.f32 %v1913_v0, %v408_v4 }
 0x55c   :  { %v413_v3 = vsel %vm412_vm4, %v1913_v0, %v409_v6 }
 0x55d   :  { %v418_v7 = vsel %vm415_vm5, %v417_v10, %v413_v3  ;;  %v1773_v3 = vsel %vm548_vm1, 1.0, %v2148_v9 }
 0x55e   :  { %v430_v27 = vsub.f32 1.0, %v418_v7  ;;  %v440_v30 = vmul.f32 %v438_v28, %v418_v7  ;;  %v1858_v10 = vpack.i.bf16 %v1773_v3, %v1772_v8 }
 0x59a   :  { %v421_v5 = vpop.permute.xlu2 %420 }
 0x59b   :  { %v423_v11 = vmul.f32 %v421_v5, %v418_v7 }
 0x59d   :  { %425 = vrot.lane.b32.xlu1 %v423_v11, %s2149_s1 }
 0x5a5   :  { %1854 = vperm.xlu1 %1841, %v1853_v15  }
 0x60f   :  { %v426_v16 = vpop.permute.xlu1 %425 }
 0x610   :  { %v428_v18 = vadd.f32 %v426_v16, %v2335_v19 }
 0x612   :  { %1914 = vtanh.f32 %v428_v18 }
 0x617   :  { %v1855_v20 = vpop.permute.xlu1 %1854 }
 0x618   :  { %v1915_v21 = vpop.eup %1914  ;;  %v1857_v22 = vunpack.i.h.bf16 %v1855_v20  ;;  %v1856_v23 = vunpack.i.l.bf16 %v1855_v20 }
 0x619   :  { %432 = vrot.lane.b32.xlu2 %v1915_v21, %s2151_s6 }
 0x61a   :  { %v730_v24 = vmul.f32 %v1857_v22, %v2355_v51  ;;  %v731_v25 = vmul.f32 %v1856_v23, %v2358_v53  ;;  %v459_v37 = vmul.f32 %v1857_v22, %v2358_v53  ;;  %v453_v38 = vmul.f32 %v1856_v23, %v2355_v51 }
 0x61c   :  { %v2418_v26 = vadd.f32 %v731_v25, %v730_v24  ;;  %v2426_v40 = vadd.f32 %v459_v37, %v453_v38 }
 0x673   :  { %v433_v29 = vpop.permute.xlu2 %432 }
 0x674   :  { %v435_v31 = vmul.f32 %v433_v29, %v430_v27 }
 0x676   :  { %v2420_v32 = vadd.f32 %v440_v30, %v435_v31 }
 0x678   :  { %v469_v33 = vsub.f32 %v2420_v32, %v438_v28  ;;  %v122_v28 = vld [vmem:[%s2832_s29 + $0x8] sm:$0xff]  ;;  %s2157_s29 = smov 72  }
 0x679   :  { %1757 = vmatmul.msk.f32.gmra.mxu0 %vm135_vm0, %v122_v28 }
 0x67a   :  { %v471_v34 = vrot.slane %v469_v33, 4 }
 0x67c   :  { %472 = vrot.lane.b32.xlu2 %v471_v34, %s2151_s6 }
 0x6d6   :  { %v473_v41 = vpop.permute.xlu2 %472 }
 0x6d7   :  { %v475_v42 = vmul.f32 %v473_v41, %v2426_v40 }
 0x6d9   :  { %v2429_v43 = vadd.f32 %v475_v42, %v373_v52 }
 0x6db   :  { %1770 = vmatmul.msk.f32.vlgmr.msrb.gmra.mxu1 %vm179_vm8, %v2429_v43  ;;  %v539_v49 = vrot.slane %v2429_v43, 2 }
 0x6f6   :  { %v162_v42 = vpop.f32.mrf.mxu0 }
 0x758   :  { %v497_v44 = vpop.f32.mrf.mxu1 }
 0x759   :  { %v498_v46 = vadd.f32 %v2325_v14, %v497_v44 }
 0x75b   :  { %v501_v47 = vrot.slane %v498_v46, 2 }
 0x75d   :  { %523 = vrot.lane.b32.xlu0 %v501_v47, %s2149_s1  ;;  %v503_v50 = vadd.f32 %v501_v47, %v2335_v19 }
 0x75f   :  { %v1771_v54 = vmul.f32 -1.442695, %v503_v50 }
 0x761   :  { %1916 = vpow2.f32 %v1771_v54 }
 0x765   :  { %540 = vrot.lane.b32.xlu0 %v539_v49, %s2152_s4 }
 0x767   :  { %v1917_v55 = vpop.eup %1916 }
 0x768   :  { %v507_v52 = vadd.f32 1.0, %v1917_v55 }
 0x76a   :  { %1918 = vrcp.f32 %v507_v52  ;;  %v519_v62 = vand.u32 2147483648, %v507_v52  ;;  %vm513_vm12 = vweird.f32 %v507_v52  ;;  %v517_v0 = vand.u32 2147483647, %v507_v52 }
 0x76c   :  { %v520_v2 = vor.u32 1.1754944e-38, %v519_v62  ;;  %vm518_vm14 = vcmp.eq.f32.partialorder %v517_v0, 8.507059e+37 }
 0x770   :  { %v1919_v56 = vpop.eup %1918 }
 0x771   :  { %v509_v57 = vmul.f32 %v1919_v56, %v507_v52  ;;  %vm514_vm11 = vweird.f32 %v1919_v56 }
 0x772   :  { %vm515_vm13 = vmor %vm513_vm12, %vm514_vm11 }
 0x773   :  { %v510_v59 = vsub.f32 1.0, %v509_v57 }
 0x775   :  { %v511_v60 = vmul.f32 %v1919_v56, %v510_v59 }
 0x777   :  { %v512_v61 = vadd.f32 %v1919_v56, %v511_v60 }
 0x779   :  { %v516_v63 = vsel %vm515_vm13, %v1919_v56, %v512_v61 }
 0x77a   :  { %v521_v6 = vsel %vm518_vm14, %v520_v2, %v516_v63 }
 0x77b   :  { %v533_v21 = vsub.f32 1.0, %v521_v6 }
 0x7cf   :  { %v524_v4 = vpop.permute.xlu0 %523 }
 0x7d0   :  { %v526_v1 = vmul.f32 %v524_v4, %v521_v6 }
 0x7d2   :  { %528 = vrot.lane.b32.xlu1 %v526_v1, %s2149_s1 }
 0x7d7   :  { %v541_v20 = vpop.permute.xlu0 %540 }
 0x7d8   :  { %v543_v23 = vmul.f32 %v541_v20, %v521_v6 }
 0x7da   :  { %1859 = vperm.xlu1 %1841, %v1858_v10  }
 0x844   :  { %v529_v5 = vpop.permute.xlu1 %528 }
 0x845   :  { %v531_v7 = vadd.f32 %v529_v5, %v2335_v19 }
 0x847   :  { %1920 = vtanh.f32 %v531_v7 }
 0x84c   :  { %v1860_v11 = vpop.permute.xlu1 %1859 }
 0x84d   :  { %v1921_v12 = vpop.eup %1920  ;;  %v1862_v13 = vunpack.i.h.bf16 %v1860_v11  ;;  %v1861_v15 = vunpack.i.l.bf16 %v1860_v11 }
 0x84e   :  { %535 = vrot.lane.b32.xlu2 %v1921_v12, %s2151_s6 }
 0x84f   :  { %v645_v39 = vmul.f32 %v1862_v13, %v2355_v51  ;;  %v646_v16 = vmul.f32 %v1861_v15, %v2358_v53  ;;  %v562_v29 = vmul.f32 %v1862_v13, %v2358_v53  ;;  %v556_v30 = vmul.f32 %v1861_v15, %v2355_v51 }
 0x850   :  { %v2468_v53 = vadd.f32 %v2332_v17, %v162_v42 }
 0x851   :  { %v2447_v18 = vadd.f32 %v646_v16, %v645_v39  ;;  %v2459_v31 = vadd.f32 %v562_v29, %v556_v30 }
 0x8a8   :  { %v536_v22 = vpop.permute.xlu2 %535 }
 0x8a9   :  { %v538_v24 = vmul.f32 %v536_v22, %v533_v21 }
 0x8ab   :  { %v2449_v25 = vadd.f32 %v543_v23, %v538_v24 }
 0x8ad   :  { %v572_v19 = vsub.f32 %v2449_v25, %v541_v20 }
 0x8af   :  { %v574_v27 = vrot.slane %v572_v19, 6 }
 0x8b1   :  { %575 = vrot.lane.b32.xlu2 %v574_v27, %s2151_s6 }
 0x90b   :  { %v576_v33 = vpop.permute.xlu2 %575 }
 0x90c   :  { %v578_v34 = vmul.f32 %v576_v33, %v2459_v31 }
 0x90e   :  { %v579_v37 = vadd.f32 %v578_v34, %v2429_v43 }
 0x910   :  { %1774 = vmatmul.msk.f32.vlgmr.msrb.gmra.mxu2 %vm179_vm8, %v579_v37 }
 0x993   :  { %v600_v38 = vpop.f32.mrf.mxu2 }
 0x994   :  { %v601_v41 = vadd.f32 %v2325_v14, %v600_v38 }
 0x996   :  { %624 = vrot.lane.b32.xlu0 %v601_v41, %s2149_s1  ;;  %v603_v51 = vadd.f32 %v601_v41, %v2468_v53 }
 0x998   :  { %v1775_v44 = vmul.f32 -1.442695, %v603_v51 }
 0x99a   :  { %1922 = vpow2.f32 %v1775_v44 }
 0x99e   :  { %640 = vrot.lane.b32.xlu0 %v579_v37, %s2152_s4 }
 0x9a0   :  { %v1923_v46 = vpop.eup %1922 }
 0x9a1   :  { %v607_v47 = vadd.f32 1.0, %v1923_v46 }
 0x9a3   :  { %1924 = vrcp.f32 %v607_v47  ;;  %v619_v52 = vand.u32 2147483648, %v607_v47  ;;  %vm613_vm2 = vweird.f32 %v607_v47  ;;  %v617_v56 = vand.u32 2147483647, %v607_v47 }
 0x9a5   :  { %v620_v17 = vor.u32 1.1754944e-38, %v619_v52  ;;  %vm618_vm4 = vcmp.eq.f32.partialorder %v617_v56, 8.507059e+37 }
 0x9a9   :  { %v1925_v43 = vpop.eup %1924 }
 0x9aa   :  { %v609_v49 = vmul.f32 %v1925_v43, %v607_v47  ;;  %vm614_vm0 = vweird.f32 %v1925_v43 }
 0x9ab   :  { %vm615_vm3 = vmor %vm613_vm2, %vm614_vm0 }
 0x9ac   :  { %v610_v50 = vsub.f32 1.0, %v609_v49 }
 0x9ae   :  { %v611_v54 = vmul.f32 %v1925_v43, %v610_v50 }
 0x9b0   :  { %v612_v55 = vadd.f32 %v1925_v43, %v611_v54 }
 0x9b2   :  { %v616_v57 = vsel %vm615_vm3, %v1925_v43, %v612_v55 }
 0x9b3   :  { %v621_v60 = vsel %vm618_vm4, %v620_v17, %v616_v57 }
 0x9b4   :  { %v634_v4 = vsub.f32 1.0, %v621_v60 }
 0xa08   :  { %v625_v59 = vpop.permute.xlu0 %624 }
 0xa09   :  { %v627_v61 = vmul.f32 %v625_v59, %v621_v60 }
 0xa0b   :  { %629 = vrot.lane.b32.xlu1 %v627_v61, %s2149_s1 }
 0xa10   :  { %v641_v2 = vpop.permute.xlu0 %640 }
 0xa11   :  { %v643_v1 = vmul.f32 %v641_v2, %v621_v60 }
 0xa7d   :  { %v630_v62 = vpop.permute.xlu1 %629 }
 0xa7e   :  { %v632_v0 = vadd.f32 %v630_v62, %v2468_v53 }
 0xa80   :  { %1926 = vtanh.f32 %v632_v0 }
 0xa86   :  { %v1927_v63 = vpop.eup %1926 }
 0xa87   :  { %636 = vrot.lane.b32.xlu2 %v1927_v63, %s2151_s6 }
 0xae1   :  { %v637_v6 = vpop.permute.xlu2 %636 }
 0xae2   :  { %v639_v8 = vmul.f32 %v637_v6, %v634_v4 }
 0xae4   :  { %v2474_v3 = vadd.f32 %v643_v1, %v639_v8 }
 0xae6   :  { %v655_v10 = vsub.f32 %v2474_v3, %v641_v2 }
 0xae8   :  { %657 = vrot.lane.b32.xlu1 %v655_v10, %s2151_s6 }
 0xb5a   :  { %v658_v5 = vpop.permute.xlu1 %657 }
 0xb5b   :  { %v660_v7 = vmul.f32 %v658_v5, %v2447_v18 }
 0xb5d   :  { %v661_v11 = vadd.f32 %v660_v7, %v579_v37 }
 0xb5f   :  { %1776 = vmatmul.msk.f32.vlgmr.msrb.gmra.mxu3 %vm179_vm8, %v661_v11  ;;  %v724_v39 = vrot.slane %v661_v11, 6 }
 0xbe2   :  { %v682_v12 = vpop.f32.mrf.mxu3 }
 0xbe3   :  { %v683_v13 = vadd.f32 %v2325_v14, %v682_v12 }
 0xbe5   :  { %v686_v15 = vrot.slane %v683_v13, 6 }
 0xbe7   :  { %708 = vrot.lane.b32.xlu2 %v686_v15, %s2149_s1  ;;  %v688_v16 = vadd.f32 %v686_v15, %v2468_v53 }
 0xbe9   :  { %v1777_v20 = vmul.f32 -1.442695, %v688_v16 }
 0xbeb   :  { %1928 = vpow2.f32 %v1777_v20 }
 0xbef   :  { %725 = vrot.lane.b32.xlu2 %v724_v39, %s2152_s4 }
 0xbf1   :  { %v1929_v21 = vpop.eup %1928 }
 0xbf2   :  { %v692_v22 = vadd.f32 1.0, %v1929_v21 }
 0xbf4   :  { %1930 = vrcp.f32 %v692_v22  ;;  %v704_v29 = vand.u32 2147483648, %v692_v22  ;;  %vm698_vm6 = vweird.f32 %v692_v22  ;;  %v702_v30 = vand.u32 2147483647, %v692_v22 }
 0xbf6   :  { %v705_v34 = vor.u32 1.1754944e-38, %v704_v29  ;;  %vm703_vm11 = vcmp.eq.f32.partialorder %v702_v30, 8.507059e+37 }
 0xbfa   :  { %v1931_v23 = vpop.eup %1930 }
 0xbfb   :  { %v694_v24 = vmul.f32 %v1931_v23, %v692_v22  ;;  %vm699_vm5 = vweird.f32 %v1931_v23 }
 0xbfc   :  { %vm700_vm7 = vmor %vm698_vm6, %vm699_vm5 }
 0xbfd   :  { %v695_v19 = vsub.f32 1.0, %v694_v24 }
 0xbff   :  { %v696_v27 = vmul.f32 %v1931_v23, %v695_v19 }
 0xc01   :  { %v697_v28 = vadd.f32 %v1931_v23, %v696_v27 }
 0xc03   :  { %v701_v33 = vsel %vm700_vm7, %v1931_v23, %v697_v28 }
 0xc04   :  { %v706_v38 = vsel %vm703_vm11, %v705_v34, %v701_v33 }
 0xc05   :  { %v718_v47 = vsub.f32 1.0, %v706_v38 }
 0xc41   :  { %v709_v37 = vpop.permute.xlu2 %708 }
 0xc42   :  { %v711_v41 = vmul.f32 %v709_v37, %v706_v38 }
 0xc44   :  { %713 = vrot.lane.b32.xlu0 %v711_v41, %s2149_s1 }
 0xc49   :  { %v726_v46 = vpop.permute.xlu2 %725 }
 0xc4a   :  { %v728_v49 = vmul.f32 %v726_v46, %v706_v38 }
 0xcb6   :  { %v714_v42 = vpop.permute.xlu0 %713 }
 0xcb7   :  { %v716_v51 = vadd.f32 %v714_v42, %v2468_v53 }
 0xcb9   :  { %1932 = vtanh.f32 %v716_v51 }
 0xcbf   :  { %v1933_v44 = vpop.eup %1932 }
 0xcc0   :  { %720 = vrot.lane.b32.xlu1 %v1933_v44, %s2151_s6 }
 0xd32   :  { %v721_v43 = vpop.permute.xlu1 %720 }
 0xd33   :  { %v723_v50 = vmul.f32 %v721_v43, %v718_v47 }
 0xd35   :  { %v2487_v54 = vadd.f32 %v728_v49, %v723_v50 }
 0xd37   :  { %v741_v55 = vsub.f32 %v2487_v54, %v726_v46  ;;  %v565_v46 = vrot.slane %v2449_v25, 6 }
 0xd39   :  { %v743_v52 = vrot.slane %v741_v55, 2 }
 0xd3b   :  { %744 = vrot.lane.b32.xlu0 %v743_v52, %s2151_s6 }
 0xdad   :  { %v745_v56 = vpop.permute.xlu0 %744 }
 0xdae   :  { %v747_v57 = vmul.f32 %v745_v56, %v2418_v26 }
 0xdb0   :  { %v748_v17 = vadd.f32 %v747_v57, %v661_v11 }
 0xdb2   :  { %1778 = vmatmul.msk.f32.vlgmr.msra.gmra.mxu1 %vm179_vm8, %v748_v17  ;;  %v811_v62 = vrot.slane %v748_v17, 4 }
 0xe2f   :  { %v769_v59 = vpop.f32.mrf.mxu1 }
 0xe30   :  { %v770_v60 = vadd.f32 %v2325_v14, %v769_v59 }
 0xe32   :  { %v773_v61 = vrot.slane %v770_v60, 4 }
 0xe34   :  { %795 = vrot.lane.b32.xlu1 %v773_v61, %s2149_s1  ;;  %v775_v0 = vadd.f32 %v773_v61, %v2468_v53 }
 0xe36   :  { %v1779_v63 = vmul.f32 -1.442695, %v775_v0 }
 0xe38   :  { %1934 = vpow2.f32 %v1779_v63 }
 0xe3c   :  { %812 = vrot.lane.b32.xlu1 %v811_v62, %s2152_s4 }
 0xe3e   :  { %v1935_v2 = vpop.eup %1934 }
 0xe3f   :  { %v779_v4 = vadd.f32 1.0, %v1935_v2 }
 0xe41   :  { %1936 = vrcp.f32 %v779_v4  ;;  %v791_v7 = vand.u32 2147483648, %v779_v4  ;;  %vm785_vm13 = vweird.f32 %v779_v4  ;;  %v789_v11 = vand.u32 2147483647, %v779_v4 }
 0xe43   :  { %v792_v13 = vor.u32 1.1754944e-38, %v791_v7  ;;  %vm790_vm15 = vcmp.eq.f32.partialorder %v789_v11, 8.507059e+37 }
 0xe47   :  { %v1937_v6 = vpop.eup %1936 }
 0xe48   :  { %v781_v1 = vmul.f32 %v1937_v6, %v779_v4  ;;  %vm786_vm12 = vweird.f32 %v1937_v6  ;;  %v359_v4 = vrot.slane %v2390_v35, 2 }
 0xe49   :  { %vm787_vm14 = vmor %vm785_vm13, %vm786_vm12 }
 0xe4a   :  { %v782_v8 = vsub.f32 1.0, %v781_v1 }
 0xe4c   :  { %v783_v10 = vmul.f32 %v1937_v6, %v782_v8 }
 0xe4e   :  { %v784_v5 = vadd.f32 %v1937_v6, %v783_v10 }
 0xe50   :  { %v788_v12 = vsel %vm787_vm14, %v1937_v6, %v784_v5  ;;  %vm1073_vm14 = vcmask 64512  }
 0xe51   :  { %v793_v39 = vsel %vm790_vm15, %v792_v13, %v788_v12 }
 0xe52   :  { %v805_v24 = vsub.f32 1.0, %v793_v39 }
 0xea6   :  { %v796_v15 = vpop.permute.xlu1 %795 }
 0xea7   :  { %v798_v16 = vmul.f32 %v796_v15, %v793_v39 }
 0xea9   :  { %800 = vrot.lane.b32.xlu2 %v798_v16, %s2149_s1 }
 0xeae   :  { %v813_v23 = vpop.permute.xlu1 %812 }
 0xeaf   :  { %v815_v27 = vmul.f32 %v813_v23, %v793_v39 }
 0xf03   :  { %v801_v20 = vpop.permute.xlu2 %800 }
 0xf04   :  { %v803_v21 = vadd.f32 %v801_v20, %v2468_v53 }
 0xf06   :  { %1938 = vtanh.f32 %v803_v21 }
 0xf0c   :  { %v1939_v22 = vpop.eup %1938 }
 0xf0d   :  { %807 = vrot.lane.b32.xlu0 %v1939_v22, %s2151_s6 }
 0xf7f   :  { %v808_v19 = vpop.permute.xlu0 %807 }
 0xf80   :  { %v810_v28 = vmul.f32 %v808_v19, %v805_v24 }
 0xf82   :  { %v816_v29 = vadd.f32 %v815_v27, %v810_v28 }
 0xf84   :  { %v828_v30 = vsub.f32 %v816_v29, %v813_v23  ;;  %v821_v47 = vrot.slane %v816_v29, 4 }
 0xf86   :  { %v830_v33 = vrot.slane %v828_v30, 4 }
 0xf88   :  { %831 = vrot.lane.b32.xlu2 %v830_v33, %s2151_s6 }
 0xfe2   :  { %v832_v34 = vpop.permute.xlu2 %831 }
 0xfe3   :  { %v834_v37 = vmul.f32 %v832_v34, %v2396_v45 }
 0xfe5   :  { %v2502_v38 = vadd.f32 %v834_v37, %v748_v17 }
 0xfe7   :  { %1780 = vmatmul.msk.f32.vlgmr.msra.gmra.mxu2 %vm179_vm8, %v2502_v38  ;;  %v898_v44 = vrot.slane %v2502_v38, 2 }
0x106a   :  { %v856_v41 = vpop.f32.mrf.mxu2 }
0x106b   :  { %v857_v42 = vadd.f32 %v2325_v14, %v856_v41 }
0x106d   :  { %v860_v51 = vrot.slane %v857_v42, 2 }
0x106f   :  { %882 = vrot.lane.b32.xlu0 %v860_v51, %s2149_s1  ;;  %v862_v43 = vadd.f32 %v860_v51, %v2468_v53 }
0x1071   :  { %v1781_v49 = vmul.f32 -1.442695, %v862_v43 }
0x1073   :  { %1940 = vpow2.f32 %v1781_v49 }
0x1077   :  { %899 = vrot.lane.b32.xlu0 %v898_v44, %s2152_s4  ;;  %s2161_s4 = smov 40  }
0x1079   :  { %v1941_v50 = vpop.eup %1940 }
0x107a   :  { %v866_v14 = vadd.f32 1.0, %v1941_v50 }
0x107c   :  { %1942 = vrcp.f32 %v866_v14  ;;  %v878_v59 = vand.u32 2147483648, %v866_v14  ;;  %vm872_vm0 = vweird.f32 %v866_v14  ;;  %v876_v25 = vand.u32 2147483647, %v866_v14 }
0x107e   :  { %v879_v61 = vor.u32 1.1754944e-38, %v878_v59  ;;  %vm877_vm3 = vcmp.eq.f32.partialorder %v876_v25, 8.507059e+37 }
0x107f   :  { %566 = vrot.lane.b32.xlu0 %v565_v46, %s2151_s6 }
0x1082   :  { %v1943_v55 = vpop.eup %1942 }
0x1083   :  { %v868_v52 = vmul.f32 %v1943_v55, %v866_v14  ;;  %vm873_vm1 = vweird.f32 %v1943_v55 }
0x1084   :  { %vm874_vm2 = vmor %vm872_vm0, %vm873_vm1 }
0x1085   :  { %v869_v56 = vsub.f32 1.0, %v868_v52  ;;  %v992_v52 = vld [vmem:[#allocation8 + $0x10] sm:$0xff] }
0x1087   :  { %822 = vrot.lane.b32.xlu0 %v821_v47, %s2151_s6  ;;  %v870_v57 = vmul.f32 %v1943_v55, %v869_v56  ;;  %v991_v56 = vld [vmem:[#allocation8 + $0x8] sm:$0xff] }
0x1089   :  { %v871_v17 = vadd.f32 %v1943_v55, %v870_v57  ;;  %v990_v57 = vld [vmem:[#allocation8] sm:$0xff] }
0x108b   :  { %v875_v60 = vsel %vm874_vm2, %v1943_v55, %v871_v17  ;;  %v993_v55 = vld [vmem:[#allocation8 + $0x18] sm:$0xff] }
0x108c   :  { %v880_v0 = vsel %vm877_vm3, %v879_v61, %v875_v60  ;;  %1016 = vmatpush.msra.mxu3 %v993_v55 }
0x108e   :  { %1017 = vmatpush.msra.mxu3 %v992_v52 }
0x1090   :  { %1018 = vmatpush.msra.mxu3 %v991_v56 }
0x1092   :  { %1019 = vmatpush.msra.mxu3 %v990_v57 }
0x10e1   :  { %v883_v62 = vpop.permute.xlu0 %882 }
0x10e2   :  { %v885_v63 = vmul.f32 %v883_v62, %v880_v0 }
0x10e4   :  { %887 = vrot.lane.b32.xlu1 %v885_v63, %s2149_s1 }
0x10e9   :  { %v2515_v2 = vpop.permute.xlu0 %899 }
0x10ea   :  { %v902_v15 = vmul.f32 %v2515_v2, %v880_v0 }
0x10ec   :  { %360 = vrot.lane.b32.xlu1 %v359_v4, %s2151_s6 }
0x10f1   :  { %v567_v6 = vpop.permute.xlu0 %566 }
0x10f2   :  { %v569_v1 = vmul.f32 %v567_v6, %v2459_v31 }
0x10f4   :  { %570 = vst.msk [vmem:[#allocation2 + $0x6] sm:$0x3] %vm266_vm9, %v569_v1  ;;  %649 = vrot.lane.b32.xlu1 %v2474_v3, %s2151_s6 }
0x10f5   :  { %571 = vst.msk [vmem:[#allocation2 + $0x8] sm:$0x3] %vm268_vm10, %v569_v1 }
0x10f9   :  { %v823_v5 = vpop.permute.xlu0 %822 }
0x10fa   :  { %v825_v31 = vmul.f32 %v823_v5, %v2396_v45  ;;  %v734_v45 = vrot.slane %v2487_v54, 2 }
0x1156   :  { %v888_v8 = vpop.permute.xlu1 %887 }
0x1157   :  { %v890_v10 = vadd.f32 %v888_v8, %v2468_v53  ;;  %v462_v53 = vrot.slane %v2420_v32, 4 }
0x1159   :  { %1944 = vtanh.f32 %v890_v10 }
0x115e   :  { %v361_v7 = vpop.permute.xlu1 %360 }
0x115f   :  { %v1945_v11 = vpop.eup %1944  ;;  %v363_v35 = vmul.f32 %v361_v7, %v2400_v48  ;;  %v892_v48 = vsub.f32 1.0, %v880_v0 }
0x1160   :  { %894 = vrot.lane.b32.xlu2 %v1945_v11, %s2151_s6 }
0x1161   :  { %364 = vst.msk [vmem:[#allocation2 + $0x2] sm:$0x3] %vm266_vm9, %v363_v35 }
0x1162   :  { %365 = vst.msk [vmem:[#allocation2 + $0xc] sm:$0x3] %vm268_vm10, %v363_v35 }
0x1163   :  { %826 = vst.msk [vmem:[#allocation2 + $0xc] sm:$0x3] %vm266_vm9, %v825_v31 }
0x1164   :  { %827 = vst.msk [vmem:[#allocation2 + $0x2] sm:$0x3] %vm268_vm10, %v825_v31 }
0x1166   :  { %v650_v3 = vpop.permute.xlu1 %649 }
0x1167   :  { %v652_v12 = vmul.f32 %v650_v3, %v2447_v18  ;;  %v1891_v3 = vld [vmem:[%s2819_s8] ss:$0 sm:$0xff]  ;;  %s1739_s8 = sshll.u32 %s2828_s17, 4  ;;  %s1740_s8 = int_to_ptr.hbm [resolvable:$true] %s1739_s8 }
0x1168   :  { %463 = vrot.lane.b32.xlu2 %v462_v53, %s2151_s6 }
0x1169   :  { %653 = vst.msk [vmem:[#allocation2 + $0x8] sm:$0x3] %vm266_vm9, %v652_v12 }
0x116a   :  { %654 = vst.msk [vmem:[#allocation2 + $0x6] sm:$0x3] %vm268_vm10, %v652_v12 }
0x1170   :  { %735 = vrot.lane.b32.xlu2 %v734_v45, %s2151_s6  ;;  %v1892_v45 = vld [vmem:[%s2820_s9] ss:$0 sm:$0xff]  ;;  %s2154_s9 = smov 120  }
0x11ba   :  { %v895_v13 = vpop.permute.xlu2 %894 }
0x11bb   :  { %v897_v39 = vmul.f32 %v895_v13, %v892_v48 }
0x11bd   :  { %v2540_v16 = vadd.f32 %v902_v15, %v897_v39 }
0x11bf   :  { %v908_v32 = vrot.slane %v2540_v16, 6 }
0x11c1   :  { %909 = vrot.lane.b32.xlu1 %v908_v32, %s2151_s6 }
0x11c2   :  { %v464_v18 = vpop.permute.xlu2 %463 }
0x11c3   :  { %v466_v20 = vmul.f32 %v464_v18, %v2426_v40 }
0x11c5   :  { %467 = vst.msk [vmem:[#allocation2 + $0x4] sm:$0x3] %vm266_vm9, %v466_v20 }
0x11c6   :  { %468 = vst.msk [vmem:[#allocation2 + $0xa] sm:$0x3] %vm268_vm10, %v466_v20  ;;  %v1893_v20 = vld [vmem:[%s2822_s11] ss:$0 sm:$0xff]  ;;  %s2156_s11 = smov 104  }
0x11ca   :  { %v736_v54 = vpop.permute.xlu2 %735 }
0x11cb   :  { %v738_v21 = vmul.f32 %v736_v54, %v2418_v26  ;;  %v2153_v26 = vmov 32.0  }
0x11cc   :  { %1946 = vrcp.f32 %v2153_v26 }
0x11cd   :  { %739 = vst.msk [vmem:[#allocation2 + $0xa] sm:$0x3] %vm266_vm9, %v738_v21 }
0x11ce   :  { %740 = vst.msk [vmem:[#allocation2 + $0x4] sm:$0x3] %vm268_vm10, %v738_v21 }
0x11d2   :  { %v1947_v28 = vpop.eup %1946 }
0x11d3   :  { %v936_v29 = vmul.f32 32.0, %v1947_v28  ;;  %vm940_vm4 = vweird.f32 %v1947_v28 }
0x11d5   :  { %v937_v30 = vsub.f32 1.0, %v936_v29 }
0x11d7   :  { %v938_v33 = vmul.f32 %v1947_v28, %v937_v30 }
0x11d9   :  { %v939_v34 = vadd.f32 %v1947_v28, %v938_v33 }
0x11db   :  { %v2555_v37 = vsel %vm940_vm4, %v1947_v28, %v939_v34 }
0x1233   :  { %v910_v22 = vpop.permute.xlu1 %909 }
0x1234   :  { %v912_v23 = vmul.f32 %v910_v22, %v2362_v58 }
0x1236   :  { %913 = vst.msk [vmem:[#allocation2 + $0xe] sm:$0x3] %vm266_vm9, %v912_v23 }
0x1237   :  { %914 = vst.msk [vmem:[#allocation2] sm:$0x3] %vm268_vm10, %v912_v23 }
0x123d   :  { %v926_v24 = vld [vmem:[#allocation2 + $0x8] sm:$0xff] }
0x123e   :  { %v932_v40 = vsel %vm179_vm8, %v926_v24, 0.0  ;;  %v925_v19 = vld [vmem:[#allocation2] sm:$0xff] }
0x123f   :  { %933 = vadd.xlane.f32.xlu0 %v932_v40  ;;  %v929_v27 = vsel %vm179_vm8, %v925_v19, 0.0  ;;  %v2605_v40 = vld [vmem:[%s2813_s2 + $0x8] sm:$0xff] }
0x1240   :  { %930 = vadd.xlane.f32.xlu2 %v929_v27  ;;  %vm1046_vm12 = vcmp.gt.f32.partialorder %v2605_v40, 0.0 }
0x12b2   :  { %v934_v41 = vpop.xlane.xlu0 %933 }
0x12b3   :  { %v943_v42 = vmul.f32 %v2555_v37, %v934_v41  ;;  %v931_v51 = vpop.xlane.xlu2 %930 }
0x12b4   :  { %v942_v44 = vmul.f32 %v2555_v37, %v931_v51 }
0x12b5   :  { %v945_v46 = vsub.f32 %v926_v24, %v943_v42  ;;  %v2600_v24 = vld [vmem:[%s2813_s2] sm:$0xff] }
0x12b6   :  { %v944_v47 = vsub.f32 %v925_v19, %v942_v44  ;;  %vm1045_vm13 = vcmp.gt.f32.partialorder %v2600_v24, 0.0  ;;  %v1048_v19 = vsel %vm1046_vm12, 1, %v2150_v36 }
0x12b7   :  { %v947_v43 = vmul.f32 %v945_v46, %v945_v46  ;;  %v1047_v27 = vsel %vm1045_vm13, 1, %v2150_v36 }
0x12b8   :  { %v946_v49 = vmul.f32 %v944_v47, %v944_v47 }
0x12b9   :  { %v951_v50 = vsel %vm179_vm8, %v947_v43, 0.0 }
0x12ba   :  { %952 = vadd.xlane.f32.xlu2 %v951_v50  ;;  %v948_v14 = vsel %vm179_vm8, %v946_v49, 0.0 }
0x12bb   :  { %949 = vadd.xlane.f32.xlu1 %v948_v14  ;;  %v1894_v14 = vld [vmem:[%s2814_s3] ss:$0 sm:$0xff]  ;;  %s2160_s3 = smov 56  }
0x132d   :  { %v953_v17 = vpop.xlane.xlu2 %952 }
0x132e   :  { %v950_v59 = vpop.xlane.xlu1 %949  ;;  %v955_v25 = vmul.f32 %v953_v17, %v2555_v37 }
0x132f   :  { %v954_v60 = vmul.f32 %v950_v59, %v2555_v37 }
0x1330   :  { %v957_v61 = vadd.f32 1e-05, %v955_v25 }
0x1331   :  { %v956_v62 = vadd.f32 1e-05, %v954_v60 }
0x1332   :  { %1948 = vrsqrt.f32 %v957_v61  ;;  %vm974_vm7 = vweird.f32 %v957_v61 }
0x1333   :  { %1950 = vrsqrt.f32 %v956_v62  ;;  %vm964_vm10 = vweird.f32 %v956_v62 }
0x1338   :  { %v1949_v0 = vpop.eup %1948 }
0x1339   :  { %v1951_v63 = vpop.eup %1950  ;;  %v969_v4 = vmul.f32 %v1949_v0, %v957_v61  ;;  %vm975_vm5 = vweird.f32 %v1949_v0 }
0x133a   :  { %v959_v6 = vmul.f32 %v1951_v63, %v956_v62  ;;  %vm965_vm9 = vweird.f32 %v1951_v63  ;;  %vm976_vm11 = vmor %vm974_vm7, %vm975_vm5 }
0x133b   :  { %v970_v1 = vmul.f32 %v1949_v0, %v969_v4  ;;  %vm966_vm6 = vmor %vm964_vm10, %vm965_vm9  ;;  %vm1109_vm9 = vcmask 130048  }
0x133c   :  { %v960_v8 = vmul.f32 %v1951_v63, %v959_v6 }
0x133d   :  { %v971_v10 = vmul.f32 0.5, %v970_v1 }
0x133e   :  { %v961_v5 = vmul.f32 0.5, %v960_v8 }
0x133f   :  { %v972_v7 = vsub.f32 1.5, %v971_v10 }
0x1340   :  { %v962_v11 = vsub.f32 1.5, %v961_v5 }
0x1341   :  { %v973_v31 = vmul.f32 %v1949_v0, %v972_v7 }
0x1342   :  { %v963_v35 = vmul.f32 %v1951_v63, %v962_v11 }
0x1343   :  { %v977_v48 = vsel %vm976_vm11, %v1949_v0, %v973_v31 }
0x1344   :  { %v967_v53 = vsel %vm966_vm6, %v1951_v63, %v963_v35  ;;  %v979_v39 = vmul.f32 %v977_v48, %v945_v46 }
0x1345   :  { %v978_v12 = vmul.f32 %v967_v53, %v944_v47 }
0x1346   :  { %v984_v32 = vmul.f32 %v1891_v3, %v979_v39 }
0x1347   :  { %v983_v13 = vmul.f32 %v1891_v3, %v978_v12 }
0x1348   :  { %v2573_v18 = vadd.f32 %v1892_v45, %v984_v32 }
0x1349   :  { %v2569_v15 = vadd.f32 %v1892_v45, %v983_v13 }
0x134b   :  { %1782 = vmatmul.msk.f32.vlgmr.msra.gmra.mxu3 %vm179_vm8, %v2569_v15 }
0x1353   :  { %1783 = vmatmul.msk.f32.gmra.mxu3 %vm179_vm8, %v2573_v18 }
0x13ce   :  { %v1021_v54 = vpop.f32.mrf.mxu3 }
0x13cf   :  { %v2580_v21 = vadd.f32 %v1893_v20, %v1021_v54 }
0x13d1   :  { %1195 = vrot.lane.b32.xlu1 %v2580_v21, %s2154_s9  ;;  %1199 = vrot.lane.b32.xlu0 %v2580_v21, %s2155_s28 }
0x13d6   :  { %v1024_v22 = vpop.f32.mrf.mxu3 }
0x13d7   :  { %v2584_v23 = vadd.f32 %v1893_v20, %v1024_v22 }
0x13d9   :  { %1197 = vrot.lane.b32.xlu1 %v2584_v23, %s2154_s9  ;;  %1071 = vrot.lane.b32.xlu0 %v2584_v23, %s2151_s6 }
0x13da   :  { %1201 = vrot.lane.b32.xlu2 %v2584_v23, %s2155_s28 }
0x13e1   :  { %1451 = vrot.lane.b32.xlu1 %v2580_v21, %s2156_s11  ;;  %1457 = vrot.lane.b32.xlu0 %v2584_v23, %s2157_s29 }
0x13e2   :  { %1069 = vrot.lane.b32.xlu2 %v2580_v21, %s2151_s6 }
0x13e9   :  { %1453 = vrot.lane.b32.xlu1 %v2584_v23, %s2156_s11  ;;  %1329 = vrot.lane.b32.xlu0 %v2584_v23, %s2158_s0 }
0x13ea   :  { %1455 = vrot.lane.b32.xlu2 %v2580_v21, %s2157_s29 }
0x13f1   :  { %1032 = vperm.xlu1 %1841, %v2600_v24   ;;  %1323 = vrot.lane.b32.xlu0 %v2580_v21, %s2159_s7  ;;  %v1612_v24 = vld [vmem:[#allocation9 + $0x10] sm:$0xff] }
0x13f2   :  { %1327 = vrot.lane.b32.xlu2 %v2580_v21, %s2158_s0 }
0x13f9   :  { %1053 = vperm.xlu1 %1841, %v1048_v19   ;;  %1050 = vperm.xlu0 %1847, %v1047_v27  }
0x13fa   :  { %1325 = vrot.lane.b32.xlu2 %v2584_v23, %s2159_s7 }
0x1402   :  { %1037 = vperm.xlu2 %1863, %v2605_v40  }
0x1434   :  { %v1202_v26 = vpop.permute.xlu2 %1201 }
0x1435   :  { %1794 = vmatpush.xpose.msk.msrb.mxu2 %vm1073_vm14, %v1202_v26 }
0x143c   :  { %v1070_v30 = vpop.permute.xlu2 %1069 }
0x1443   :  { %v1200_v28 = vpop.permute.xlu0 %1199  ;;  %v1196_v29 = vpop.permute.xlu1 %1195 }
0x1444   :  { %1795 = vmatpush.xpose.msk.msrb.mxu2 %vm1073_vm14, %v1200_v28  ;;  %v1456_v41 = vpop.permute.xlu2 %1455 }
0x1447   :  { %1796 = vmatmul.msk.f32.vlgmr.msrb.gmra.mxu2 %vm1073_vm14, %v1196_v29 }
0x144b   :  { %v1072_v33 = vpop.permute.xlu0 %1071  ;;  %v1198_v36 = vpop.permute.xlu1 %1197 }
0x144c   :  { %1788 = vmatpush.xpose.msk.msrb.mxu0 %vm1073_vm14, %v1072_v33  ;;  %1814 = vmatpush.xpose.msk.msrb.mxu1 %vm1073_vm14, %v1072_v33  ;;  %v1328_v44 = vpop.permute.xlu2 %1327 }
0x144f   :  { %1797 = vmatmul.msk.f32.gmra.mxu2 %vm1073_vm14, %v1198_v36  ;;  %v2664_v36 = vpack.i.bf16 %v2580_v21, %v2584_v23 }
0x1450   :  { %1789 = vmatpush.xpose.msk.msrb.mxu0 %vm1073_vm14, %v1070_v30  ;;  %1815 = vmatpush.xpose.msk.msrb.mxu1 %vm1073_vm14, %v1070_v30 }
0x1453   :  { %v1458_v34 = vpop.permute.xlu0 %1457  ;;  %1790 = vmatmul.msk.f32.vlgmr.msrb.gmra.mxu0 %vm1073_vm14, %v2580_v21  ;;  %1791 = vmatmul.msk.f32.vlgmr.msrb.gmra.mxu1 %vm1073_vm14, %v2584_v23  ;;  %v1452_v42 = vpop.permute.xlu1 %1451 }
0x1454   :  { %1806 = vmatpush.xpose.msk.msra.mxu2 %vm1073_vm14, %v1458_v34  ;;  %v1326_v43 = vpop.permute.xlu2 %1325 }
0x1458   :  { %1807 = vmatpush.xpose.msk.msra.mxu2 %vm1073_vm14, %v1456_v41 }
0x145b   :  { %v1330_v51 = vpop.permute.xlu0 %1329  ;;  %1808 = vmatmul.msk.f32.vlgmr.msra.gmra.mxu2 %vm1073_vm14, %v1452_v42  ;;  %v1454_v46 = vpop.permute.xlu1 %1453 }
0x145c   :  { %1800 = vmatpush.xpose.msk.msra.mxu0 %vm1073_vm14, %v1330_v51  ;;  %v1038_v52 = vpop.permute.xlu2 %1037 }
0x145d   :  { %vm1044_vm3 = vcmp.eq.f32.partialorder %v1038_v52, %v1894_v14 }
0x1460   :  { %1801 = vmatpush.xpose.msk.msra.mxu0 %vm1073_vm14, %v1328_v44 }
0x1463   :  { %v1324_v47 = vpop.permute.xlu0 %1323  ;;  %1809 = vmatmul.msk.f32.gmra.mxu2 %vm1073_vm14, %v1454_v46  ;;  %v1033_v49 = vpop.permute.xlu1 %1032 }
0x1464   :  { %1802 = vmatmul.msk.f32.vlgmr.msra.gmra.mxu0 %vm1073_vm14, %v1324_v47  ;;  %vm1043_vm1 = vcmp.eq.f32.partialorder %v1033_v49, %v1894_v14 }
0x146b   :  { %v1051_v50 = vpop.permute.xlu0 %1050  ;;  %v1054_v55 = vpop.permute.xlu1 %1053 }
0x146c   :  { %1803 = vmatmul.msk.f32.gmra.mxu0 %vm1073_vm14, %v1326_v43  ;;  %vm1055_vm15 = vcmp.eq.s32.totalorder %v1051_v50, 1  ;;  %vm1056_vm2 = vcmp.eq.s32.totalorder %v1054_v55, 1 }
0x146d   :  { %vm1057_vm0 = vmand %vm1043_vm1, %vm1055_vm15 }
0x146e   :  { %v2644_v56 = vsel %vm1057_vm0, 1.0, %v2148_v9  ;;  %vm1058_vm4 = vmand %vm1044_vm3, %vm1056_vm2 }
0x146f   :  { %v1784_v57 = vadd.f32 -1.0, %v2644_v56  ;;  %v2648_v17 = vsel %vm1058_vm4, 1.0, %v2148_v9 }
0x1470   :  { %v1785_v61 = vadd.f32 -1.0, %v2648_v17 }
0x1471   :  { %v1063_v25 = vmul.f32 1e+08, %v1784_v57 }
0x1472   :  { %v1064_v6 = vmul.f32 1e+08, %v1785_v61 }
0x14ca   :  { %v1228_v59 = vpop.f32.mrf.mxu2 }
0x14cb   :  { %v1234_v60 = vmul.f32 0.35355338, %v1228_v59 }
0x14cd   :  { %v1236_v62 = vadd.f32 %v1234_v60, %v1063_v25 }
0x14cf   :  { %v1238_v0 = vsel %vm1109_vm9, %v1236_v62, -inf }
0x14d0   :  { %1239 = vmax.xlane.f32.xlu0 %v1238_v0  ;;  %v1099_v63 = vpop.f32.mrf.mxu0  ;;  %v1102_v4 = vpop.f32.mrf.mxu1 }
0x14d1   :  { %v1105_v1 = vmul.f32 0.35355338, %v1099_v63  ;;  %v1106_v8 = vmul.f32 0.35355338, %v1102_v4 }
0x14d2   :  { %v1231_v10 = vpop.f32.mrf.mxu2 }
0x14d3   :  { %v1235_v5 = vmul.f32 0.35355338, %v1231_v10  ;;  %v1107_v7 = vadd.f32 %v1105_v1, %v1063_v25  ;;  %v1108_v11 = vadd.f32 %v1106_v8, %v1064_v6 }
0x14d5   :  { %v1110_v35 = vsel %vm1109_vm9, %v1107_v7, -inf  ;;  %v1237_v31 = vadd.f32 %v1235_v5, %v1064_v6  ;;  %v1113_v53 = vsel %vm1109_vm9, %v1108_v11, -inf }
0x14d6   :  { %1111 = vmax.xlane.f32.xlu2 %v1110_v35 }
0x14d7   :  { %v1241_v3 = vsel %vm1109_vm9, %v1237_v31, -inf }
0x14d8   :  { %1242 = vmax.xlane.f32.xlu1 %v1241_v3  ;;  %1114 = vmax.xlane.f32.xlu0 %v1113_v53 }
0x14de   :  { %v1484_v12 = vpop.f32.mrf.mxu2 }
0x14df   :  { %v1490_v28 = vmul.f32 0.35355338, %v1484_v12 }
0x14e1   :  { %v1356_v45 = vpop.f32.mrf.mxu0  ;;  %v2658_v30 = vadd.f32 %v1490_v28, %v1063_v25 }
0x14e2   :  { %v1362_v48 = vmul.f32 0.35355338, %v1356_v45 }
0x14e3   :  { %v1494_v33 = vsel %vm1109_vm9, %v2658_v30, -inf }
0x14e4   :  { %v1364_v13 = vadd.f32 %v1362_v48, %v1063_v25 }
0x14e6   :  { %v1487_v39 = vpop.f32.mrf.mxu2  ;;  %v1366_v32 = vsel %vm1109_vm9, %v1364_v13, -inf }
0x14e7   :  { %v1491_v20 = vmul.f32 0.35355338, %v1487_v39  ;;  %1367 = vmax.xlane.f32.xlu1 %v1366_v32 }
0x14e9   :  { %v1493_v54 = vadd.f32 %v1491_v20, %v1064_v6  ;;  %v1359_v22 = vpop.f32.mrf.mxu0 }
0x14ea   :  { %v1363_v19 = vmul.f32 0.35355338, %v1359_v22 }
0x14eb   :  { %v1497_v27 = vsel %vm1109_vm9, %v1493_v54, -inf }
0x14ec   :  { %1498 = vmax.xlane.f32.xlu0 %v1497_v27  ;;  %v1365_v26 = vadd.f32 %v1363_v19, %v1064_v6 }
0x14ee   :  { %v1369_v29 = vsel %vm1109_vm9, %v1365_v26, -inf }
0x14ef   :  { %1370 = vmax.xlane.f32.xlu2 %v1369_v29 }
0x14f7   :  { %1495 = vmax.xlane.f32.xlu2 %v1494_v33 }
0x150f   :  { %1865 = vrot.lane.b32.xlu2 %v2664_v36, %s2160_s3 }
0x1543   :  { %v1240_v34 = vpop.xlane.xlu0 %1239 }
0x1544   :  { %v1244_v41 = vsub.f32 %v1236_v62, %v1240_v34 }
0x1546   :  { %v1246_v42 = vmul.f32 1.442695, %v1244_v41 }
0x1548   :  { %1952 = vpow2.f32 %v1246_v42 }
0x1549   :  { %v1112_v51 = vpop.xlane.xlu2 %1111 }
0x154a   :  { %v1116_v44 = vsub.f32 %v1107_v7, %v1112_v51 }
0x154b   :  { %v1243_v46 = vpop.xlane.xlu1 %1242  ;;  %v1115_v47 = vpop.xlane.xlu0 %1114 }
0x154c   :  { %v1118_v43 = vmul.f32 1.442695, %v1116_v44  ;;  %v1245_v49 = vsub.f32 %v1237_v31, %v1243_v46  ;;  %v1117_v50 = vsub.f32 %v1108_v11, %v1115_v47 }
0x154e   :  { %v2667_v14 = vpop.eup %1952  ;;  %1954 = vpow2.f32 %v1118_v43  ;;  %v1248_v55 = vmul.f32 1.442695, %v1245_v49  ;;  %v1120_v21 = vmul.f32 1.442695, %v1117_v50 }
0x154f   :  { %v1250_v23 = vsel %vm1109_vm9, %v2667_v14, 0.0 }
0x1550   :  { %1956 = vpow2.f32 %v1248_v55  ;;  %1251 = vadd.xlane.f32.xlu1 %v1250_v23 }
0x1551   :  { %1958 = vpow2.f32 %v1120_v21 }
0x1554   :  { %v2671_v52 = vpop.eup %1954 }
0x1555   :  { %v1122_v57 = vsel %vm1109_vm9, %v2671_v52, 0.0 }
0x1556   :  { %v2675_v59 = vpop.eup %1956  ;;  %1123 = vadd.xlane.f32.xlu0 %v1122_v57 }
0x1557   :  { %v2677_v25 = vpop.eup %1958  ;;  %v1253_v60 = vsel %vm1109_vm9, %v2675_v59, 0.0 }
0x1558   :  { %1254 = vadd.xlane.f32.xlu2 %v1253_v60  ;;  %v1125_v61 = vsel %vm1109_vm9, %v2677_v25, 0.0 }
0x1559   :  { %1126 = vadd.xlane.f32.xlu1 %v1125_v61 }
0x155a   :  { %v1368_v62 = vpop.xlane.xlu1 %1367 }
0x155b   :  { %v1372_v0 = vsub.f32 %v1364_v13, %v1368_v62 }
0x155d   :  { %v1374_v63 = vmul.f32 1.442695, %v1372_v0 }
0x155f   :  { %1960 = vpow2.f32 %v1374_v63  ;;  %v1499_v4 = vpop.xlane.xlu0 %1498 }
0x1560   :  { %v1501_v6 = vsub.f32 %v1493_v54, %v1499_v4 }
0x1562   :  { %v1504_v1 = vmul.f32 1.442695, %v1501_v6  ;;  %v1371_v8 = vpop.xlane.xlu2 %1370 }
0x1563   :  { %v1373_v5 = vsub.f32 %v1365_v26, %v1371_v8 }
0x1564   :  { %1962 = vpow2.f32 %v1504_v1 }
0x1565   :  { %v2683_v10 = vpop.eup %1960  ;;  %v1376_v11 = vmul.f32 1.442695, %v1373_v5 }
0x1566   :  { %v1378_v7 = vsel %vm1109_vm9, %v2683_v10, 0.0 }
0x1567   :  { %1379 = vadd.xlane.f32.xlu1 %v1378_v7  ;;  %1964 = vpow2.f32 %v1376_v11 }
0x156a   :  { %1870 = vrot.lane.b32.xlu0 %v2664_v36, %s2149_s1  ;;  %v1496_v35 = vpop.xlane.xlu2 %1495  ;;  %v2689_v31 = vpop.eup %1962  ;;  %s2162_s1 = smov 48  }
0x156b   :  { %v1509_v3 = vsel %vm1109_vm9, %v2689_v31, 0.0  ;;  %v1500_v39 = vsub.f32 %v2658_v30, %v1496_v35 }
0x156d   :  { %v2694_v12 = vpop.eup %1964  ;;  %v1502_v32 = vmul.f32 1.442695, %v1500_v39 }
0x156e   :  { %v1381_v13 = vsel %vm1109_vm9, %v2694_v12, 0.0 }
0x156f   :  { %1510 = vadd.xlane.f32.xlu1 %v1509_v3  ;;  %1966 = vpow2.f32 %v1502_v32 }
0x1570   :  { %1875 = vrot.lane.b32.xlu2 %v2664_v36, %s2161_s4 }
0x1572   :  { %v1866_v53 = vpop.permute.xlu2 %1865 }
0x1573   :  { %v1867_v45 = vunpack.i.l.bf16 %v1866_v53  ;;  %v1868_v48 = vunpack.i.h.bf16 %v1866_v53 }
0x1575   :  { %1314 = vmatpush.msrb.mxu3 %v1867_v45  ;;  %v2699_v20 = vpop.eup %1966 }
0x1576   :  { %v1506_v54 = vsel %vm1109_vm9, %v2699_v20, 0.0 }
0x1577   :  { %1382 = vadd.xlane.f32.xlu1 %v1381_v13  ;;  %1315 = vmatpush.msrb.mxu3 %v1868_v48 }
0x1594   :  { %1507 = vadd.xlane.f32.xlu0 %v1506_v54 }
0x15a8   :  { %1880 = vrot.lane.b32.xlu0 %v2664_v36, %s2162_s1 }
0x15c3   :  { %v1252_v22 = vpop.xlane.xlu1 %1251 }
0x15c4   :  { %1968 = vrcp.f32 %v1252_v22  ;;  %v1265_v33 = vand.u32 2147483647, %v1252_v22  ;;  %v1267_v34 = vand.u32 2147483648, %v1252_v22  ;;  %vm1261_vm5 = vweird.f32 %v1252_v22 }
0x15c6   :  { %vm1266_vm7 = vcmp.eq.f32.partialorder %v1265_v33, 8.507059e+37  ;;  %v1268_v46 = vor.u32 1.1754944e-38, %v1267_v34 }
0x15c9   :  { %v1124_v19 = vpop.xlane.xlu0 %1123 }
0x15ca   :  { %v1969_v27 = vpop.eup %1968  ;;  %1970 = vrcp.f32 %v1124_v19  ;;  %v1137_v50 = vand.u32 2147483647, %v1124_v19  ;;  %v1139_v57 = vand.u32 2147483648, %v1124_v19  ;;  %vm1133_vm15 = vweird.f32 %v1124_v19 }
0x15cb   :  { %v1257_v26 = vmul.f32 %v1969_v27, %v1252_v22  ;;  %v1255_v28 = vpop.xlane.xlu2 %1254  ;;  %vm1262_vm10 = vweird.f32 %v1969_v27 }
0x15cc   :  { %v2704_v29 = vpop.xlane.xlu1 %1126  ;;  %1972 = vrcp.f32 %v1255_v28  ;;  %vm1263_vm6 = vmor %vm1261_vm5, %vm1262_vm10  ;;  %v1282_v6 = vand.u32 2147483648, %v1255_v28  ;;  %v1140_v11 = vor.u32 1.1754944e-38, %v1139_v57  ;;  %v1280_v3 = vand.u32 2147483647, %v1255_v28 }
0x15cd   :  { %v1258_v30 = vsub.f32 1.0, %v1257_v26  ;;  %1974 = vrcp.f32 %v2704_v29  ;;  %vm1138_vm2 = vcmp.eq.f32.partialorder %v1137_v50, 8.507059e+37  ;;  %vm1276_vm4 = vweird.f32 %v1255_v28 }
0x15ce   :  { %vm1148_vm10 = vweird.f32 %v2704_v29  ;;  %v1154_v13 = vand.u32 2147483648, %v2704_v29  ;;  %v1283_v39 = vor.u32 1.1754944e-38, %v1282_v6  ;;  %v1152_v54 = vand.u32 2147483647, %v2704_v29 }
0x15cf   :  { %v1259_v41 = vmul.f32 %v1969_v27, %v1258_v30 }
0x15d0   :  { %v1971_v42 = vpop.eup %1970  ;;  %v1155_v33 = vor.u32 1.1754944e-38, %v1154_v13 }
0x15d1   :  { %v1260_v51 = vadd.f32 %v1969_v27, %v1259_v41  ;;  %v1129_v36 = vmul.f32 %v1971_v42, %v1124_v19  ;;  %vm1134_vm11 = vweird.f32 %v1971_v42 }
0x15d2   :  { %v1973_v44 = vpop.eup %1972  ;;  %vm1135_vm1 = vmor %vm1133_vm15, %vm1134_vm11  ;;  %vm1153_vm11 = vcmp.eq.f32.partialorder %v1152_v54, 8.507059e+37 }
0x15d3   :  { %v1975_v47 = vpop.eup %1974  ;;  %v1264_v43 = vsel %vm1263_vm6, %v1969_v27, %v1260_v51  ;;  %v1130_v49 = vsub.f32 1.0, %v1129_v36  ;;  %v1272_v55 = vmul.f32 %v1973_v44, %v1255_v28  ;;  %v1876_v21 = vpop.permute.xlu2 %1875  ;;  %vm1277_vm0 = vweird.f32 %v1973_v44 }
0x15d4   :  { %v1269_v23 = vsel %vm1266_vm7, %v1268_v46, %v1264_v43  ;;  %v1144_v60 = vmul.f32 %v1975_v47, %v2704_v29  ;;  %v1877_v63 = vunpack.i.l.bf16 %v1876_v21  ;;  %v1878_v5 = vunpack.i.h.bf16 %v1876_v21  ;;  %vm1278_vm5 = vmor %vm1276_vm4, %vm1277_vm0 }
0x15d5   :  { %v1270_v61 = vmul.f32 %v2667_v14, %v1269_v23  ;;  %v1131_v62 = vmul.f32 %v1971_v42, %v1130_v49  ;;  %v1273_v0 = vsub.f32 1.0, %v1272_v55  ;;  %vm1149_vm3 = vweird.f32 %v1975_v47 }
0x15d6   :  { %v1145_v4 = vsub.f32 1.0, %v1144_v60  ;;  %1570 = vmatpush.msra.mxu3 %v1877_v63  ;;  %vm1281_vm6 = vcmp.eq.f32.partialorder %v1280_v3, 8.507059e+37  ;;  %vm1150_vm7 = vmor %vm1148_vm10, %vm1149_vm3 }
0x15d7   :  { %v1132_v1 = vadd.f32 %v1971_v42, %v1131_v62  ;;  %v1274_v8 = vmul.f32 %v1973_v44, %v1273_v0  ;;  %v1286_v7 = vmul.f32 %v1270_v61, %v2644_v56 }
0x15d8   :  { %v1146_v35 = vmul.f32 %v1975_v47, %v1145_v4  ;;  %1571 = vmatpush.msra.mxu3 %v1878_v5 }
0x15d9   :  { %v1136_v53 = vsel %vm1135_vm1, %v1971_v42, %v1132_v1  ;;  %v1275_v14 = vadd.f32 %v1973_v44, %v1274_v8  ;;  %1798 = vmatmul.msk.f32.vlgmr.msrb.gmra.mxu3 %vm1109_vm9, %v1286_v7 }
0x15da   :  { %v1141_v45 = vsel %vm1138_vm2, %v1140_v11, %v1136_v53  ;;  %v1147_v48 = vadd.f32 %v1975_v47, %v1146_v35 }
0x15db   :  { %v1142_v32 = vmul.f32 %v2671_v52, %v1141_v45  ;;  %v1279_v19 = vsel %vm1278_vm5, %v1973_v44, %v1275_v14 }
0x15dc   :  { %v1871_v22 = vpop.permute.xlu0 %1870  ;;  %v1284_v26 = vsel %vm1281_vm6, %v1283_v39, %v1279_v19  ;;  %v1151_v30 = vsel %vm1150_vm7, %v1975_v47, %v1147_v48 }
0x15dd   :  { %v1872_v27 = vunpack.i.l.bf16 %v1871_v22  ;;  %v1285_v28 = vmul.f32 %v2675_v59, %v1284_v26  ;;  %v1873_v34 = vunpack.i.h.bf16 %v1871_v22  ;;  %v1158_v42 = vmul.f32 %v1142_v32, %v2644_v56  ;;  %v1380_v59 = vpop.xlane.xlu1 %1379 }
0x15de   :  { %v1156_v52 = vsel %vm1153_vm11, %v1155_v33, %v1151_v30  ;;  %1976 = vrcp.f32 %v1380_v59  ;;  %v1395_v0 = vand.u32 2147483648, %v1380_v59  ;;  %vm1389_vm1 = vweird.f32 %v1380_v59 }
0x15df   :  { %1186 = vmatpush.msra.mxu1 %v1872_v27  ;;  %v1287_v41 = vmul.f32 %v1285_v28, %v2648_v17  ;;  %v1157_v29 = vmul.f32 %v2677_v25, %v1156_v52  ;;  %v1393_v1 = vand.u32 2147483647, %v1380_v59 }
0x15e0   :  { %v1396_v3 = vor.u32 1.1754944e-38, %v1395_v0 }
0x15e1   :  { %1187 = vmatpush.msra.mxu1 %v1873_v34  ;;  %1799 = vmatmul.msk.f32.gmra.mxu3 %vm1109_vm9, %v1287_v41  ;;  %v1159_v51 = vmul.f32 %v1157_v29, %v2648_v17  ;;  %vm1394_vm10 = vcmp.eq.f32.partialorder %v1393_v1, 8.507059e+37 }
0x15e2   :  { %1792 = vmatmul.msk.f32.vlgmr.msra.gmra.mxu1 %vm1109_vm9, %v1158_v42 }
0x15e4   :  { %v1977_v46 = vpop.eup %1976 }
0x15e5   :  { %v1511_v36 = vpop.xlane.xlu1 %1510  ;;  %v1385_v47 = vmul.f32 %v1977_v46, %v1380_v59  ;;  %vm1390_vm15 = vweird.f32 %v1977_v46 }
0x15e6   :  { %1978 = vrcp.f32 %v1511_v36  ;;  %vm2731_vm0 = vmor %vm1389_vm1, %vm1390_vm15  ;;  %vm1532_vm5 = vweird.f32 %v1511_v36  ;;  %v1538_v48 = vand.u32 2147483648, %v1511_v36  ;;  %v1536_v32 = vand.u32 2147483647, %v1511_v36 }
0x15e7   :  { %v1386_v50 = vsub.f32 1.0, %v1385_v47 }
0x15e8   :  { %v1539_v34 = vor.u32 1.1754944e-38, %v1538_v48 }
0x15e9   :  { %v1387_v21 = vmul.f32 %v1977_v46, %v1386_v50 }
0x15ea   :  { %1793 = vmatmul.msk.f32.gmra.mxu1 %vm1109_vm9, %v1159_v51 }
0x15eb   :  { %v1388_v62 = vadd.f32 %v1977_v46, %v1387_v21 }
0x15ec   :  { %v1979_v43 = vpop.eup %1978 }
0x15ed   :  { %v2724_v44 = vpop.xlane.xlu1 %1382  ;;  %v1528_v25 = vmul.f32 %v1979_v43, %v1511_v36  ;;  %v1392_v35 = vsel %vm2731_vm0, %v1977_v46, %v1388_v62  ;;  %vm1533_vm3 = vweird.f32 %v1979_v43  ;;  %vm1537_vm0 = vcmp.eq.f32.partialorder %v1536_v32, 8.507059e+37 }
0x15ee   :  { %1980 = vrcp.f32 %v2724_v44  ;;  %v1397_v39 = vsel %vm1394_vm10, %v1396_v3, %v1392_v35  ;;  %vm2738_vm11 = vmor %vm1532_vm5, %vm1533_vm3  ;;  %v1410_v26 = vand.u32 2147483648, %v2724_v44  ;;  %vm1404_vm1 = vweird.f32 %v2724_v44 }
0x15ef   :  { %v1529_v57 = vsub.f32 1.0, %v1528_v25  ;;  %v1398_v33 = vmul.f32 %v2683_v10, %v1397_v39  ;;  %v1408_v41 = vand.u32 2147483647, %v2724_v44 }
0x15f1   :  { %v1530_v4 = vmul.f32 %v1979_v43, %v1529_v57  ;;  %vm1409_vm3 = vcmp.eq.f32.partialorder %v1408_v41, 8.507059e+37  ;;  %v1414_v10 = vmul.f32 %v1398_v33, %v2644_v56  ;;  %v915_v33 = vsub.f32 %v2540_v16, %v2515_v2 }
0x15f3   :  { %v1531_v14 = vadd.f32 %v1979_v43, %v1530_v4 }
0x15f4   :  { %v2727_v55 = vpop.eup %1980 }
0x15f5   :  { %v1400_v23 = vmul.f32 %v2727_v55, %v2724_v44  ;;  %vm1405_vm15 = vweird.f32 %v2727_v55  ;;  %v1535_v30 = vsel %vm2738_vm11, %v1979_v43, %v1531_v14 }
0x15f6   :  { %v1540_v51 = vsel %vm1537_vm0, %v1539_v34, %v1535_v30  ;;  %v917_v34 = vrot.slane %v915_v33, 6 }
0x15f7   :  { %v1401_v63 = vsub.f32 1.0, %v1400_v23  ;;  %v1541_v44 = vmul.f32 %v2689_v31, %v1540_v51  ;;  %v1786_v31 = vsel %vm1045_vm13, 1.0, %v2148_v9  ;;  %vm923_vm13 = vcmask 254976  }
0x15f9   :  { %v1402_v53 = vmul.f32 %v2727_v55, %v1401_v63  ;;  %v1543_v43 = vmul.f32 %v1541_v44, %v2648_v17 }
0x15fb   :  { %v1403_v19 = vadd.f32 %v2727_v55, %v1402_v53  ;;  %v1895_v53 = vld [vmem:[%s2824_s13] ss:$0 sm:$0xff]  ;;  %s2165_s13 = smov [#allocation12]  }
0x1607   :  { %v1508_v49 = vpop.xlane.xlu0 %1507 }
0x1608   :  { %1982 = vrcp.f32 %v1508_v49  ;;  %v1523_v8 = vand.u32 2147483648, %v1508_v49  ;;  %v1521_v11 = vand.u32 2147483647, %v1508_v49  ;;  %vm1517_vm4 = vweird.f32 %v1508_v49 }
0x160a   :  { %v1524_v13 = vor.u32 1.1754944e-38, %v1523_v8  ;;  %vm1522_vm7 = vcmp.eq.f32.partialorder %v1521_v11, 8.507059e+37 }
0x160e   :  { %v1983_v60 = vpop.eup %1982 }
0x160f   :  { %v1513_v61 = vmul.f32 %v1983_v60, %v1508_v49  ;;  %vm1518_vm2 = vweird.f32 %v1983_v60 }
0x1610   :  { %vm1519_vm6 = vmor %vm1517_vm4, %vm1518_vm2 }
0x1611   :  { %v1514_v6 = vsub.f32 1.0, %v1513_v61  ;;  %vm1406_vm2 = vmor %vm1404_vm1, %vm1405_vm15  ;;  %v1610_v61 = vld [vmem:[#allocation9] sm:$0xff] }
0x1612   :  { %v1407_v59 = vsel %vm1406_vm2, %v2727_v55, %v1403_v19 }
0x1613   :  { %v1515_v7 = vmul.f32 %v1983_v60, %v1514_v6 }
0x1615   :  { %v1516_v45 = vadd.f32 %v1983_v60, %v1515_v7 }
0x1617   :  { %v1520_v54 = vsel %vm1519_vm6, %v1983_v60, %v1516_v45  ;;  %v1613_v60 = vld [vmem:[#allocation9 + $0x18] sm:$0xff] }
0x1618   :  { %v1525_v27 = vsel %vm1522_vm7, %v1524_v13, %v1520_v54  ;;  %1636 = vmatpush.msrb.mxu0 %v1613_v60 }
0x1619   :  { %v1526_v28 = vmul.f32 %v2699_v20, %v1525_v27  ;;  %v1411_v20 = vor.u32 1.1754944e-38, %v1410_v26 }
0x161a   :  { %v1881_v42 = vpop.permute.xlu0 %1880  ;;  %1637 = vmatpush.msrb.mxu0 %v1612_v24 }
0x161b   :  { %v1882_v52 = vunpack.i.l.bf16 %v1881_v42  ;;  %v1542_v29 = vmul.f32 %v1526_v28, %v2644_v56  ;;  %v1883_v36 = vunpack.i.h.bf16 %v1881_v42  ;;  %v1412_v46 = vsel %vm1409_vm3, %v1411_v20, %v1407_v59 }
0x161c   :  { %v1413_v47 = vmul.f32 %v2694_v12, %v1412_v46  ;;  %v1787_v56 = vsel %vm1046_vm12, 1.0, %v2148_v9  ;;  %v1611_v9 = vld [vmem:[#allocation9 + $0x8] sm:$0xff]  ;;  %vm1607_vm12 = vcmask 195584  }
0x161d   :  { %1442 = vmatpush.msrb.mxu1 %v1882_v52  ;;  %1810 = vmatmul.msk.f32.vlgmr.msra.gmra.mxu3 %vm1109_vm9, %v1542_v29  ;;  %v1884_v55 = vpack.i.bf16 %v1787_v56, %v1786_v31 }
0x161e   :  { %v1415_v49 = vmul.f32 %v1413_v47, %v2648_v17  ;;  %1638 = vmatpush.msrb.mxu0 %v1611_v9 }
0x161f   :  { %1443 = vmatpush.msrb.mxu1 %v1883_v36 }
0x1620   :  { %1804 = vmatmul.msk.f32.vlgmr.msrb.gmra.mxu1 %vm1109_vm9, %v1414_v10  ;;  %1639 = vmatpush.msrb.mxu0 %v1610_v61 }
0x1625   :  { %1811 = vmatmul.msk.f32.gmra.mxu3 %vm1109_vm9, %v1543_v43 }
0x1628   :  { %1805 = vmatmul.msk.f32.gmra.mxu1 %vm1109_vm9, %v1415_v49 }
0x165c   :  { %v1317_v50 = vpop.f32.mrf.mxu3 }
0x165d   :  { %1581 = vrot.lane.b32.xlu1 %v1317_v50, %s2144_s19 }
0x165f   :  { %v1189_v12 = vpop.f32.mrf.mxu1 }
0x1664   :  { %v1320_v21 = vpop.f32.mrf.mxu3 }
0x1667   :  { %v1192_v25 = vpop.f32.mrf.mxu1 }
0x169d   :  { %v1445_v23 = vpop.f32.mrf.mxu1 }
0x169e   :  { %1589 = vrot.lane.b32.xlu2 %v1445_v23, %s2163_s23 }
0x16a0   :  { %v1573_v17 = vpop.f32.mrf.mxu3 }
0x16a1   :  { %1597 = vrot.lane.b32.xlu0 %v1573_v17, %s2164_s24 }
0x16a5   :  { %v1448_v57 = vpop.f32.mrf.mxu1 }
0x16a6   :  { %1583 = vrot.lane.b32.xlu2 %v1320_v21, %s2144_s19  ;;  %v1896_v21 = vld [vmem:[%s2825_s14] ss:$0 sm:$0xff]  ;;  %s2166_s14 = smov [#allocation11]  }
0x16a7   :  { %s1723_s11 = sshll.u32 %s2166_s14, 4  ;;  %s1724_s11 = int_to_ptr.vmem [resolvable:$true] %s1723_s11 }
0x16a8   :  { %v1576_v40 = vpop.f32.mrf.mxu3 }
0x16a9   :  { %1591 = vrot.lane.b32.xlu0 %v1448_v57, %s2163_s23 }
0x16ae   :  { %1599 = vrot.lane.b32.xlu2 %v1576_v40, %s2164_s24  ;;  %v1897_v40 = vld [vmem:[%s2826_s15] ss:$0 sm:$0xff] }
0x16b1   :  { %1885 = vperm.xlu0 %1847, %v1884_v55  }
0x16cf   :  { %v1582_v0 = vpop.permute.xlu1 %1581 }
0x16d0   :  { %v1603_v63 = vsel %vm1073_vm14, %v1189_v12, %v1582_v0 }
0x16f8   :  { %v1590_v62 = vpop.permute.xlu2 %1589 }
0x16f9   :  { %v1605_v6 = vsel %vm1109_vm9, %v1603_v63, %v1590_v62 }
0x1700   :  { %v1584_v4 = vpop.permute.xlu2 %1583 }
0x1701   :  { %v1604_v5 = vsel %vm1073_vm14, %v1192_v25, %v1584_v4 }
0x1708   :  { %v1600_v11 = vpop.permute.xlu2 %1599 }
0x1713   :  { %v1598_v1 = vpop.permute.xlu0 %1597 }
0x1714   :  { %v1608_v8 = vsel %vm1607_vm12, %v1605_v6, %v1598_v1 }
0x1715   :  { %1812 = vmatmul.msk.f32.vlgmr.msrb.gmra.mxu0 %vm179_vm8, %v1608_v8 }
0x171b   :  { %v1592_v7 = vpop.permute.xlu0 %1591 }
0x171c   :  { %v1606_v35 = vsel %vm1109_vm9, %v1604_v5, %v1592_v7 }
0x171d   :  { %v1609_v3 = vsel %vm1607_vm12, %v1606_v35, %v1600_v11 }
0x171e   :  { %1813 = vmatmul.msk.f32.gmra.mxu0 %vm179_vm8, %v1609_v3 }
0x1723   :  { %v1886_v14 = vpop.permute.xlu0 %1885 }
0x1724   :  { %v1887_v48 = vunpack.i.l.bf16 %v1886_v14  ;;  %v1888_v19 = vunpack.i.h.bf16 %v1886_v14 }
0x1792   :  { %v1641_v45 = vpop.f32.mrf.mxu0 }
0x1793   :  { %v1642_v13 = vadd.f32 %v1895_v53, %v1641_v45 }
0x1795   :  { %v1657_v39 = vmul.f32 %v1887_v48, %v1642_v13 }
0x1797   :  { %v1659_v32 = vadd.f32 %v1657_v39, %v2569_v15 }
0x1799   :  { %v1663_v54 = vsel %vm179_vm8, %v1659_v32, 0.0 }
0x179a   :  { %1664 = vadd.xlane.f32.xlu1 %v1663_v54 }
0x179b   :  { %v1644_v22 = vpop.f32.mrf.mxu0 }
0x179c   :  { %v1645_v27 = vadd.f32 %v1895_v53, %v1644_v22 }
0x179e   :  { %v1658_v26 = vmul.f32 %v1888_v19, %v1645_v27 }
0x17a0   :  { %v1660_v28 = vadd.f32 %v1658_v26, %v2573_v18 }
0x17a2   :  { %v1666_v30 = vsel %vm179_vm8, %v1660_v28, 0.0 }
0x17a3   :  { %1667 = vadd.xlane.f32.xlu2 %v1666_v30 }
0x17bb   :  { %918 = vrot.lane.b32.xlu2 %v917_v34, %s2151_s6  ;;  %s1737_s6 = sshll.u32 %s2165_s13, 4  ;;  %s1738_s6 = int_to_ptr.vmem [resolvable:$true] %s1737_s6 }
0x180d   :  { %v1665_v41 = vpop.xlane.xlu1 %1664 }
0x180e   :  { %v1669_v15 = vmul.f32 %v1665_v41, %v2555_v37 }
0x1810   :  { %v1671_v42 = vsub.f32 %v1659_v32, %v1669_v15 }
0x1812   :  { %v1673_v52 = vmul.f32 %v1671_v42, %v1671_v42 }
0x1814   :  { %v1675_v29 = vsel %vm179_vm8, %v1673_v52, 0.0 }
0x1815   :  { %1676 = vadd.xlane.f32.xlu0 %v1675_v29 }
0x1816   :  { %v1668_v51 = vpop.xlane.xlu2 %1667 }
0x1817   :  { %v1670_v18 = vmul.f32 %v1668_v51, %v2555_v37 }
0x1819   :  { %v1672_v59 = vsub.f32 %v1660_v28, %v1670_v18 }
0x181b   :  { %v1674_v20 = vmul.f32 %v1672_v59, %v1672_v59 }
0x181d   :  { %v1678_v36 = vsel %vm179_vm8, %v1674_v20, 0.0 }
0x181e   :  { %1679 = vadd.xlane.f32.xlu1 %v1678_v36  ;;  %v919_v2 = vpop.permute.xlu2 %918 }
0x181f   :  { %v921_v16 = vmul.f32 %v919_v2, %v2362_v58 }
0x1821   :  { %v922_v10 = vadd.f32 %v921_v16, %v2502_v38 }
0x1823   :  { %924 = vst.msk [vmem:[#allocation12] sm:$0x3] %vm923_vm13, %v922_v10 }
0x1824   :  { %1742 = dma.vmem_to_hbm [thread:$0]  %s1738_s6, 32, %s1740_s8, [#allocation13]  }
0x1888   :  { %v1677_v44 = vpop.xlane.xlu0 %1676 }
0x1889   :  { %v1681_v46 = vmul.f32 %v1677_v44, %v2555_v37 }
0x188b   :  { %v1683_v47 = vadd.f32 1e-05, %v1681_v46 }
0x188d   :  { %1984 = vrsqrt.f32 %v1683_v47  ;;  %vm1691_vm9 = vweird.f32 %v1683_v47 }
0x1891   :  { %v1680_v43 = vpop.xlane.xlu1 %1679 }
0x1892   :  { %v1682_v58 = vmul.f32 %v1680_v43, %v2555_v37 }
0x1893   :  { %v1985_v49 = vpop.eup %1984 }
0x1894   :  { %v1686_v38 = vmul.f32 %v1985_v49, %v1683_v47  ;;  %v1684_v50 = vadd.f32 1e-05, %v1682_v58  ;;  %vm1692_vm14 = vweird.f32 %v1985_v49 }
0x1895   :  { %vm1693_vm4 = vmor %vm1691_vm9, %vm1692_vm14 }
0x1896   :  { %v1687_v56 = vmul.f32 %v1985_v49, %v1686_v38  ;;  %1986 = vrsqrt.f32 %v1684_v50  ;;  %vm1701_vm5 = vweird.f32 %v1684_v50 }
0x1898   :  { %v1688_v31 = vmul.f32 0.5, %v1687_v56 }
0x189a   :  { %v1689_v12 = vsub.f32 1.5, %v1688_v31 }
0x189c   :  { %v1987_v55 = vpop.eup %1986  ;;  %v1690_v25 = vmul.f32 %v1985_v49, %v1689_v12 }
0x189d   :  { %v1696_v23 = vmul.f32 %v1987_v55, %v1684_v50  ;;  %vm1702_vm10 = vweird.f32 %v1987_v55 }
0x189e   :  { %v1694_v17 = vsel %vm1693_vm4, %v1985_v49, %v1690_v25  ;;  %vm1703_vm6 = vmor %vm1701_vm5, %vm1702_vm10 }
0x189f   :  { %v1705_v57 = vmul.f32 %v1694_v17, %v1671_v42  ;;  %v1697_v37 = vmul.f32 %v1987_v55, %v1696_v23 }
0x18a1   :  { %v1710_v60 = vmul.f32 %v1896_v21, %v1705_v57  ;;  %v1698_v24 = vmul.f32 0.5, %v1697_v37 }
0x18a3   :  { %v1699_v9 = vsub.f32 1.5, %v1698_v24  ;;  %v1715_v61 = vadd.f32 %v1897_v40, %v1710_v60 }
0x18a5   :  { %v1700_v62 = vmul.f32 %v1987_v55, %v1699_v9  ;;  %1717 = vst.msk [vmem:[#allocation11] sm:$0xff] %vm179_vm8, %v1715_v61 }
0x18a7   :  { %v1704_v0 = vsel %vm1703_vm6, %v1987_v55, %v1700_v62 }
0x18a8   :  { %v1706_v63 = vmul.f32 %v1704_v0, %v1672_v59 }
0x18aa   :  { %v1711_v4 = vmul.f32 %v1896_v21, %v1706_v63 }
0x18ac   :  { %v1716_v6 = vadd.f32 %v1897_v40, %v1711_v4 }
0x18ae   :  { %1718 = vst.msk [vmem:[#allocation11 + $0x8] sm:$0xff] %vm179_vm8, %v1716_v6 }
0x18af   :  { %1731 = dma.vmem_to_hbm [thread:$0]  %s1724_s11, 256, %s1726_s30, [#allocation5], %s2143_s18, %s2143_s18, %s2144_s19  }
0x18b0   :  { %2138 = dma.done.wait [#allocation5], 256  }
0x18b1   :  { %2139 = vsyncadd [#allocation5], 4294967040 }
0x18b2   :  { %2140 = dma.done.wait [#allocation13], 32  }
0x18b3   :  { %2141 = vsyncadd [#allocation13], 4294967264 }
0x18b4   :  { %1751 = vsyncpa [#allocation4], 1 }
0x18b5   :  { %1752 = vsyncpa [#allocation7], 1 }
0x18b6   :  { %1753 = vsyncpa [#allocation10], 1 }
0x18b7   :  { %1754 = vsyncpa [#allocation5], 1 }
0x18b8   :  { %1755 = vsyncpa [#allocation13], 1 }

</bundles_post_ra>
